<compile_context>
chip_gen: v6e
topology: v6e:2x2x1
jax: 0.10.0
libtpu: 0.0.40
codegen_flags: <defaults>
</compile_context>

<pallas_src>
import jax
import jax.numpy as jnp
from jax.experimental import pallas as pl
from jax.experimental.pallas import tpu as pltpu

DROPOUT = 0.4
HIDDEN = 16
N_UNITS = 8
N_UNITS_OVERALL = 8
N_UNITS_SURFACE = 8
PLAYER_HIDDEN = 16
TOURNAMENT_HIDDEN = 2
GRU_H = 8                                  # all four GRUs have hidden size 8
N_GRU = 4
HM = N_GRU * GRU_H                         # merged GRU hidden width = 32
PP = 2 * PLAYER_HIDDEN                     # merged player MLP width = 32
CAT_DIM = TOURNAMENT_HIDDEN + PP + HM      # 66
GI_PAD = 128                               # per-timestep gi slab width (one lane tile)
OUT_PAD = 128                              # lane-dense output width


def _ceil_to(x, m):
    return -(-x // m) * m


def tennis_kernel(slab_ref,
                  wih_ref, gib_ref, whh_ref, bhn_ref,
                  wpp1_ref, bpp1_ref, wpp2_ref, bpp2_ref,
                  w1t_ref, w1pp_ref, w1g_ref, bfc1_ref,
                  wfc2_ref, bfc2_ref, out_ref):
    B = slab_ref.shape[0]
    P12 = wpp1_ref.shape[0]
    T = wih_ref.shape[0] // N_GRU

    c_pp = TOURNAMENT_HIDDEN
    c_seq = c_pp + P12
    c_msk = c_seq + T * N_GRU

    slab = slab_ref[...]
    tour = slab[:, :TOURNAMENT_HIDDEN]
    p12 = slab[:, c_pp:c_seq]
    seq = slab[:, c_seq:c_msk]
    m_tour = slab[:, c_msk:c_msk + TOURNAMENT_HIDDEN]
    m_pp = slab[:, c_msk + TOURNAMENT_HIDDEN:c_msk + TOURNAMENT_HIDDEN + PP]
    m_gru = slab[:, c_msk + TOURNAMENT_HIDDEN + PP:c_msk + CAT_DIM]

    # ---- merged player1|player2 MLP (block-diagonal weights) ---------------
    x23 = jax.nn.sigmoid(jnp.dot(p12, wpp1_ref[...],
                                 preferred_element_type=jnp.float32) + bpp1_ref[...])
    x23 = jnp.tanh(jnp.dot(x23, wpp2_ref[...],
                           preferred_element_type=jnp.float32) + bpp2_ref[...])

    # ---- GRU input-gate terms for ALL T steps in one matmul ----------------
    # wih is block-diagonal (T*4, T*128); gib already includes b_ih (+ b_hr,
    # b_hz folded into the r/z gates).  Per-t slabs are 128-lane aligned.
    gi = jnp.dot(seq, wih_ref[...], preferred_element_type=jnp.float32) + gib_ref[...]

    whh = whh_ref[...]                                   # (32, 96) block-diagonal
    bhn = jnp.broadcast_to(bhn_ref[...], (B, HM))        # b_hn broadcast hoisted

    # t = 0 peeled: h == 0, so the (B,32)@(32,96) matmul is skipped.
    r = jax.nn.sigmoid(gi[:, 0:HM])
    z = jax.nn.sigmoid(gi[:, HM:2 * HM])
    n = jnp.tanh(gi[:, 2 * HM:3 * HM] + r * bhn)
    h = (1.0 - z) * n

    for t in range(1, T):                                # static unroll, serial
        base = t * GI_PAD
        gh = jnp.dot(h, whh, preferred_element_type=jnp.float32)      # (B, 96)
        r = jax.nn.sigmoid(gi[:, base:base + HM] + gh[:, :HM])
        z = jax.nn.sigmoid(gi[:, base + HM:base + 2 * HM] + gh[:, HM:2 * HM])
        n = jnp.tanh(gi[:, base + 2 * HM:base + 3 * HM] + r * (gh[:, 2 * HM:] + bhn))
        h = (1.0 - z) * n + z * h
    g_out = jnp.tanh(h)          # reference applies F.tanh to the final hidden

    # ---- dropout (pre-scaled host masks) + fc1 via 3 partial matmuls -------
    y = (jnp.dot(tour * m_tour, w1t_ref[...], preferred_element_type=jnp.float32)
         + jnp.dot(x23 * m_pp, w1pp_ref[...], preferred_element_type=jnp.float32)
         + jnp.dot(g_out * m_gru, w1g_ref[...], preferred_element_type=jnp.float32)
         + bfc1_ref[...])
    y = jnp.tanh(y)

    # fc2 weight zero-padded to 128 output lanes -> unmasked lane-dense store.
    out_ref[...] = jnp.tanh(jnp.dot(y, wfc2_ref[...],
                                    preferred_element_type=jnp.float32) + bfc2_ref[...])


def tennis_forward(params, tournament, player1, player2,
                   h2h_overall, h2h_surface, shape_p1, shape_p2,
                   *, dropout_key=None, training=True):
    assert tournament.shape[1] == TOURNAMENT_HIDDEN
    B = tournament.shape[0]
    T = h2h_overall.shape[1]
    P1, P2 = player1.shape[1], player2.shape[1]
    P12 = P1 + P2

    # torch.flip(dims=[1]) then flatten time-major per row: column t*4+g.
    seqs = jnp.stack([h2h_overall, h2h_surface, shape_p1, shape_p2],
                     axis=-1).astype(jnp.float32)
    seqs = seqs[:, ::-1, :].reshape(B, T * N_GRU)

    # Dropout keep-mask, already scaled by 1/(1-p).
    if training:
        if dropout_key is None:
            dropout_key = jax.random.PRNGKey(0)
        keep = jax.random.bernoulli(dropout_key, 1.0 - DROPOUT, (B, CAT_DIM))
        mask = keep.astype(jnp.float32) * (1.0 / (1.0 - DROPOUT))
    else:
        mask = jnp.ones((B, CAT_DIM), jnp.float32)

    # One lane-packed, batch-major slab: [tour | p1 | p2 | seq(T*4) | mask(66)].
    feat = jnp.concatenate([tournament.astype(jnp.float32),
                            player1.astype(jnp.float32),
                            player2.astype(jnp.float32),
                            seqs, mask], axis=1)
    FW = feat.shape[1]

    # Batch padding + block size: blocks of up to 512 rows; keep >= 2 blocks
    # whenever possible so both TensorCores are used on v7x.
    B8 = max(8, _ceil_to(B, 8))
    n_blocks = max(1, -(-B8 // 512))
    if B8 >= 16:
        n_blocks = max(n_blocks, 2)
    BB = _ceil_to(-(-B8 // n_blocks), 8)
    B_pad = n_blocks * BB
    feat = jnp.pad(feat, ((0, B_pad - B), (0, 0)))

    # Host-side expansion of the block-diagonal per-timestep input-gate weight
    # (each per-t 96-wide slab padded to its own 128-lane tile).  Tiny; could
    # be cached per T if this wrapper is called repeatedly.
    wih_m = params["gru_wih_m"]                                  # (4, 96)
    wih_big = jnp.zeros((T * N_GRU, T * GI_PAD), jnp.float32)
    for t in range(T):
        wih_big = wih_big.at[t * N_GRU:(t + 1) * N_GRU,
                             t * GI_PAD:t * GI_PAD + 3 * HM].set(wih_m)
    gib_pad = jnp.pad(params["gru_gib_m"], ((0, 0), (0, GI_PAD - 3 * HM)))
    gib_big = jnp.tile(gib_pad, (1, T))                          # (1, T*128)

    args = (feat, wih_big, gib_big, params["gru_whh_m"], params["gru_bhn"],
            params["w_pp1"], params["b_pp1"], params["w_pp2"], params["b_pp2"],
            params["wfc1_tour"], params["wfc1_pp"], params["wfc1_gru"],
            params["bfc1"], params["wfc2_pad"], params["bfc2_pad"])

    in_specs = [pl.BlockSpec((BB, FW), lambda i: (i, 0))] + \
               [pl.BlockSpec(a.shape, lambda i: (0, 0)) for a in args[1:]]

    out = pl.pallas_call(
        tennis_kernel,
        out_shape=jax.ShapeDtypeStruct((B_pad, OUT_PAD), jnp.float32),
        grid=(B_pad // BB,),
        in_specs=in_specs,
        out_specs=pl.BlockSpec((BB, OUT_PAD), lambda i: (i, 0)),
        compiler_params=pltpu.CompilerParams(
            dimension_semantics=("parallel",)),
    )(*args)
    return out[:B, :1]


def init_params(key, input_shapes):
    """Deterministic init mimicking torch defaults (uniform(-1/sqrt(fan), +))."""
    keys = iter(jax.random.split(key, 64))

    def linear(fan_in, fan_out):
        bound = 1.0 / float(fan_in) ** 0.5
        w = jax.random.uniform(next(keys), (fan_out, fan_in), jnp.float32, -bound, bound)
        b = jax.random.uniform(next(keys), (fan_out,), jnp.float32, -bound, bound)
        return w, b

    def gru(hidden):
        bound = 1.0 / float(hidden) ** 0.5
        w_ih = jax.random.uniform(next(keys), (3 * hidden, 1), jnp.float32, -bound, bound)
        w_hh = jax.random.uniform(next(keys), (3 * hidden, hidden), jnp.float32, -bound, bound)
        b_ih = jax.random.uniform(next(keys), (3 * hidden,), jnp.float32, -bound, bound)
        b_hh = jax.random.uniform(next(keys), (3 * hidden,), jnp.float32, -bound, bound)
        return w_ih, w_hh, b_ih, b_hh

    P1, P2 = input_shapes[1], input_shapes[2]
    wp1, bp1 = linear(P1, PLAYER_HIDDEN)
    w2p1, b2p1 = linear(PLAYER_HIDDEN, PLAYER_HIDDEN)
    wp2, bp2 = linear(P2, PLAYER_HIDDEN)
    w2p2, b2p2 = linear(PLAYER_HIDDEN, PLAYER_HIDDEN)
    grus = [gru(GRU_H) for _ in range(N_GRU)]   # h2h_overall, h2h_surface, shape1, shape2
    wfc1, bfc1 = linear(CAT_DIM, HIDDEN)
    wfc2, bfc2 = linear(HIDDEN, 1)

    # --- merged player1/player2 MLP: block-diagonal (P1+P2,32) and (32,32) ---
    w_pp1 = jnp.zeros((P1 + P2, PP), jnp.float32)
    w_pp1 = w_pp1.at[:P1, :PLAYER_HIDDEN].set(wp1.T)
    w_pp1 = w_pp1.at[P1:, PLAYER_HIDDEN:].set(wp2.T)
    b_pp1 = jnp.concatenate([bp1, bp2]).reshape(1, -1)
    w_pp2 = jnp.zeros((PP, PP), jnp.float32)
    w_pp2 = w_pp2.at[:PLAYER_HIDDEN, :PLAYER_HIDDEN].set(w2p1.T)
    w_pp2 = w_pp2.at[PLAYER_HIDDEN:, PLAYER_HIDDEN:].set(w2p2.T)
    b_pp2 = jnp.concatenate([b2p1, b2p2]).reshape(1, -1)

    # --- merged block-diagonal GRU weights.  Gate layout [r | z | n], each ---
    # HM=32 lanes wide; within a gate, GRU g occupies columns g*8:(g+1)*8.
    wih_m = jnp.zeros((N_GRU, 3 * HM), jnp.float32)
    whh_m = jnp.zeros((HM, 3 * HM), jnp.float32)
    bih_m = jnp.zeros((1, 3 * HM), jnp.float32)
    bhh_m = jnp.zeros((1, 3 * HM), jnp.float32)
    for g, (w_ih, w_hh, b_ih, b_hh) in enumerate(grus):
        for gate in range(3):
            cols = slice(gate * HM + g * GRU_H, gate * HM + (g + 1) * GRU_H)
            rows_ = slice(gate * GRU_H, (gate + 1) * GRU_H)
            wih_m = wih_m.at[g, cols].set(w_ih[rows_, 0])
            whh_m = whh_m.at[g * GRU_H:(g + 1) * GRU_H, cols].set(w_hh[rows_, :].T)
            bih_m = bih_m.at[0, cols].set(b_ih[rows_])
            bhh_m = bhh_m.at[0, cols].set(b_hh[rows_])
    # Fold b_hr / b_hz into the input-gate bias; b_hn MUST stay separate
    # (it is multiplied by r inside the n-gate).
    gib_m = bih_m.at[:, :2 * HM].add(bhh_m[:, :2 * HM])
    bhn_m = bhh_m[:, 2 * HM:]

    # --- fc1 split into [tour | player1+player2 | gru] slabs -----------------
    wfc1_t = wfc1.T                                   # (66, 16)
    c0 = TOURNAMENT_HIDDEN
    c1 = c0 + PP
    wfc2_pad = jnp.zeros((HIDDEN, OUT_PAD), jnp.float32).at[:, 0].set(wfc2[0, :])
    bfc2_pad = jnp.zeros((1, OUT_PAD), jnp.float32).at[0, 0].set(bfc2[0])

    return {
        "w_pp1": w_pp1, "b_pp1": b_pp1, "w_pp2": w_pp2, "b_pp2": b_pp2,
        "gru_wih_m": wih_m, "gru_gib_m": gib_m,
        "gru_whh_m": whh_m, "gru_bhn": bhn_m,
        "wfc1_tour": wfc1_t[0:c0], "wfc1_pp": wfc1_t[c0:c1],
        "wfc1_gru": wfc1_t[c1:CAT_DIM],
        "bfc1": bfc1.reshape(1, -1),
        "wfc2_pad": wfc2_pad, "bfc2_pad": bfc2_pad,
    }


if __name__ == "__main__":
    B, T = 4, 8
    # input_shapes[0] must equal TOURNAMENT_HIDDEN (x1 is concatenated raw).
    input_shapes = [TOURNAMENT_HIDDEN, 12, 12]

    key = jax.random.PRNGKey(0)
    kparams, kdata, kdrop = jax.random.split(key, 3)
    params = init_params(kparams, input_shapes)

    ks = jax.random.split(kdata, 7)
    tournament = jax.random.normal(ks[0], (B, input_shapes[0]), jnp.float32)
    player1 = jax.random.normal(ks[1], (B, input_shapes[1]), jnp.float32)
    player2 = jax.random.normal(ks[2], (B, input_shapes[2]), jnp.float32)
    h2h_overall = jax.random.normal(ks[3], (B, T), jnp.float32)
    h2h_surface = jax.random.normal(ks[4], (B, T), jnp.float32)
    shape_p1 = jax.random.normal(ks[5], (B, T), jnp.float32)
    shape_p2 = jax.random.normal(ks[6], (B, T), jnp.float32)

    out = tennis_forward(params, tournament, player1, player2,
                         h2h_overall, h2h_surface, shape_p1, shape_p2,
                         dropout_key=kdrop, training=True)
    out = jax.block_until_ready(out)
    assert out.shape == (B, 1), out.shape
    assert bool(jnp.all(jnp.isfinite(out)))
    print("KERNEL_OK")
</pallas_src>

<mosaic_0001>
module attributes {stable_mosaic.version = 11 : i64} {
  func.func @tennis_kernel(%arg0: i32, %arg1: memref<8x124xf32, #tpu.memory_space<vmem>>, %arg2: memref<32x1024xf32, #tpu.memory_space<vmem>>, %arg3: memref<1x1024xf32, #tpu.memory_space<vmem>>, %arg4: memref<32x96xf32, #tpu.memory_space<vmem>>, %arg5: memref<1x32xf32, #tpu.memory_space<vmem>>, %arg6: memref<24x32xf32, #tpu.memory_space<vmem>>, %arg7: memref<1x32xf32, #tpu.memory_space<vmem>>, %arg8: memref<32x32xf32, #tpu.memory_space<vmem>>, %arg9: memref<1x32xf32, #tpu.memory_space<vmem>>, %arg10: memref<2x16xf32, #tpu.memory_space<vmem>>, %arg11: memref<32x16xf32, #tpu.memory_space<vmem>>, %arg12: memref<32x16xf32, #tpu.memory_space<vmem>>, %arg13: memref<1x16xf32, #tpu.memory_space<vmem>>, %arg14: memref<16x128xf32, #tpu.memory_space<vmem>>, %arg15: memref<1x128xf32, #tpu.memory_space<vmem>>, %arg16: memref<8x128xf32, #tpu.memory_space<vmem>>) attributes {dimension_semantics = [#tpu.dimension_semantics<parallel>], iteration_bounds = array<i64: 1>, scalar_prefetch = 0 : i64, scratch_operands = 0 : i64, tpu.core_type = #tpu.core_type<tc>, window_params = [{transform_indices = @transform_0, window_bounds = array<i64: 8, 124>}, {pipeline_mode = #tpu.pipeline_mode<synchronous>, transform_indices = @transform_1, window_bounds = array<i64: 32, 1024>}, {pipeline_mode = #tpu.pipeline_mode<synchronous>, transform_indices = @transform_2, window_bounds = array<i64: 1, 1024>}, {pipeline_mode = #tpu.pipeline_mode<synchronous>, transform_indices = @transform_3, window_bounds = array<i64: 32, 96>}, {pipeline_mode = #tpu.pipeline_mode<synchronous>, transform_indices = @transform_4, window_bounds = array<i64: 1, 32>}, {pipeline_mode = #tpu.pipeline_mode<synchronous>, transform_indices = @transform_5, window_bounds = array<i64: 24, 32>}, {pipeline_mode = #tpu.pipeline_mode<synchronous>, transform_indices = @transform_6, window_bounds = array<i64: 1, 32>}, {pipeline_mode = #tpu.pipeline_mode<synchronous>, transform_indices = @transform_7, window_bounds = array<i64: 32, 32>}, {pipeline_mode = #tpu.pipeline_mode<synchronous>, transform_indices = @transform_8, window_bounds = array<i64: 1, 32>}, {pipeline_mode = #tpu.pipeline_mode<synchronous>, transform_indices = @transform_9, window_bounds = array<i64: 2, 16>}, {pipeline_mode = #tpu.pipeline_mode<synchronous>, transform_indices = @transform_10, window_bounds = array<i64: 32, 16>}, {pipeline_mode = #tpu.pipeline_mode<synchronous>, transform_indices = @transform_11, window_bounds = array<i64: 32, 16>}, {pipeline_mode = #tpu.pipeline_mode<synchronous>, transform_indices = @transform_12, window_bounds = array<i64: 1, 16>}, {pipeline_mode = #tpu.pipeline_mode<synchronous>, transform_indices = @transform_13, window_bounds = array<i64: 16, 128>}, {pipeline_mode = #tpu.pipeline_mode<synchronous>, transform_indices = @transform_14, window_bounds = array<i64: 1, 128>}, {transform_indices = @transform_15, window_bounds = array<i64: 8, 128>}]} {
    %c0 = arith.constant 0 : index
    %c0_0 = arith.constant 0 : index
    %0 = vector.load %arg1[%c0, %c0_0] : memref<8x124xf32, #tpu.memory_space<vmem>>, vector<8x124xf32>
    %1 = vector.extract_strided_slice %0 {offsets = [0, 0], sizes = [8, 2], strides = [1, 1]} : vector<8x124xf32> to vector<8x2xf32>
    %2 = vector.extract_strided_slice %0 {offsets = [0, 2], sizes = [8, 24], strides = [1, 1]} : vector<8x124xf32> to vector<8x24xf32>
    %3 = vector.extract_strided_slice %0 {offsets = [0, 26], sizes = [8, 32], strides = [1, 1]} : vector<8x124xf32> to vector<8x32xf32>
    %4 = vector.extract_strided_slice %0 {offsets = [0, 58], sizes = [8, 2], strides = [1, 1]} : vector<8x124xf32> to vector<8x2xf32>
    %5 = vector.extract_strided_slice %0 {offsets = [0, 60], sizes = [8, 32], strides = [1, 1]} : vector<8x124xf32> to vector<8x32xf32>
    %6 = vector.extract_strided_slice %0 {offsets = [0, 92], sizes = [8, 32], strides = [1, 1]} : vector<8x124xf32> to vector<8x32xf32>
    %c0_1 = arith.constant 0 : index
    %c0_2 = arith.constant 0 : index
    %7 = vector.load %arg6[%c0_1, %c0_2] : memref<24x32xf32, #tpu.memory_space<vmem>>, vector<24x32xf32>
    %cst = arith.constant dense<0.000000e+00> : vector<8x32xf32>
    %8 = tpu.matmul %2, %7, %cst {dimension_numbers = #tpu.dot_dimension_numbers<[1], [0], [0], [1], [0, 0, 1, 1], [], []>} : vector<8x24xf32>, vector<24x32xf32>, vector<8x32xf32> -> vector<8x32xf32>
    %c0_3 = arith.constant 0 : index
    %c0_4 = arith.constant 0 : index
    %9 = vector.load %arg7[%c0_3, %c0_4] : memref<1x32xf32, #tpu.memory_space<vmem>>, vector<1x32xf32>
    %10 = vector.broadcast %9 : vector<1x32xf32> to vector<8x32xf32>
    %11 = arith.addf %8, %10 : vector<8x32xf32>
    %12 = arith.negf %11 : vector<8x32xf32>
    %13 = math.exp %12 : vector<8x32xf32>
    %cst_5 = arith.constant 1.000000e+00 : f32
    %14 = vector.broadcast %cst_5 : f32 to vector<8x32xf32>
    %15 = arith.addf %14, %13 : vector<8x32xf32>
    %16 = arith.divf %14, %15 : vector<8x32xf32>
    %c0_6 = arith.constant 0 : index
    %c0_7 = arith.constant 0 : index
    %17 = vector.load %arg8[%c0_6, %c0_7] : memref<32x32xf32, #tpu.memory_space<vmem>>, vector<32x32xf32>
    %cst_8 = arith.constant dense<0.000000e+00> : vector<8x32xf32>
    %18 = tpu.matmul %16, %17, %cst_8 {dimension_numbers = #tpu.dot_dimension_numbers<[1], [0], [0], [1], [0, 0, 1, 1], [], []>} : vector<8x32xf32>, vector<32x32xf32>, vector<8x32xf32> -> vector<8x32xf32>
    %c0_9 = arith.constant 0 : index
    %c0_10 = arith.constant 0 : index
    %19 = vector.load %arg9[%c0_9, %c0_10] : memref<1x32xf32, #tpu.memory_space<vmem>>, vector<1x32xf32>
    %20 = vector.broadcast %19 : vector<1x32xf32> to vector<8x32xf32>
    %21 = arith.addf %18, %20 : vector<8x32xf32>
    %22 = math.tanh %21 : vector<8x32xf32>
    %c0_11 = arith.constant 0 : index
    %c0_12 = arith.constant 0 : index
    %23 = vector.load %arg2[%c0_11, %c0_12] : memref<32x1024xf32, #tpu.memory_space<vmem>>, vector<32x1024xf32>
    %cst_13 = arith.constant dense<0.000000e+00> : vector<8x1024xf32>
    %24 = tpu.matmul %3, %23, %cst_13 {dimension_numbers = #tpu.dot_dimension_numbers<[1], [0], [0], [1], [0, 0, 1, 1], [], []>} : vector<8x32xf32>, vector<32x1024xf32>, vector<8x1024xf32> -> vector<8x1024xf32>
    %c0_14 = arith.constant 0 : index
    %c0_15 = arith.constant 0 : index
    %25 = vector.load %arg3[%c0_14, %c0_15] : memref<1x1024xf32, #tpu.memory_space<vmem>>, vector<1x1024xf32>
    %26 = vector.broadcast %25 : vector<1x1024xf32> to vector<8x1024xf32>
    %27 = arith.addf %24, %26 : vector<8x1024xf32>
    %c0_16 = arith.constant 0 : index
    %c0_17 = arith.constant 0 : index
    %28 = vector.load %arg4[%c0_16, %c0_17] : memref<32x96xf32, #tpu.memory_space<vmem>>, vector<32x96xf32>
    %c0_18 = arith.constant 0 : index
    %c0_19 = arith.constant 0 : index
    %29 = vector.load %arg5[%c0_18, %c0_19] : memref<1x32xf32, #tpu.memory_space<vmem>>, vector<1x32xf32>
    %30 = vector.shape_cast %29 : vector<1x32xf32> to vector<1x32xf32>
    %31 = vector.broadcast %30 : vector<1x32xf32> to vector<8x32xf32>
    %32 = vector.extract_strided_slice %27 {offsets = [0, 0], sizes = [8, 32], strides = [1, 1]} : vector<8x1024xf32> to vector<8x32xf32>
    %33 = arith.negf %32 : vector<8x32xf32>
    %34 = math.exp %33 : vector<8x32xf32>
    %cst_20 = arith.constant 1.000000e+00 : f32
    %35 = vector.broadcast %cst_20 : f32 to vector<8x32xf32>
    %36 = arith.addf %35, %34 : vector<8x32xf32>
    %37 = arith.divf %35, %36 : vector<8x32xf32>
    %38 = vector.extract_strided_slice %27 {offsets = [0, 32], sizes = [8, 32], strides = [1, 1]} : vector<8x1024xf32> to vector<8x32xf32>
    %39 = arith.negf %38 : vector<8x32xf32>
    %40 = math.exp %39 : vector<8x32xf32>
    %cst_21 = arith.constant 1.000000e+00 : f32
    %41 = vector.broadcast %cst_21 : f32 to vector<8x32xf32>
    %42 = arith.addf %41, %40 : vector<8x32xf32>
    %43 = arith.divf %41, %42 : vector<8x32xf32>
    %44 = vector.extract_strided_slice %27 {offsets = [0, 64], sizes = [8, 32], strides = [1, 1]} : vector<8x1024xf32> to vector<8x32xf32>
    %45 = arith.mulf %37, %31 : vector<8x32xf32>
    %46 = arith.addf %44, %45 : vector<8x32xf32>
    %47 = math.tanh %46 : vector<8x32xf32>
    %cst_22 = arith.constant 1.000000e+00 : f32
    %48 = vector.broadcast %cst_22 : f32 to vector<8x32xf32>
    %49 = arith.subf %48, %43 : vector<8x32xf32>
    %50 = arith.mulf %49, %47 : vector<8x32xf32>
    %cst_23 = arith.constant dense<0.000000e+00> : vector<8x96xf32>
    %51 = tpu.matmul %50, %28, %cst_23 {dimension_numbers = #tpu.dot_dimension_numbers<[1], [0], [0], [1], [0, 0, 1, 1], [], []>} : vector<8x32xf32>, vector<32x96xf32>, vector<8x96xf32> -> vector<8x96xf32>
    %52 = vector.extract_strided_slice %27 {offsets = [0, 128], sizes = [8, 32], strides = [1, 1]} : vector<8x1024xf32> to vector<8x32xf32>
    %53 = vector.extract_strided_slice %51 {offsets = [0, 0], sizes = [8, 32], strides = [1, 1]} : vector<8x96xf32> to vector<8x32xf32>
    %54 = arith.addf %52, %53 : vector<8x32xf32>
    %55 = arith.negf %54 : vector<8x32xf32>
    %56 = math.exp %55 : vector<8x32xf32>
    %cst_24 = arith.constant 1.000000e+00 : f32
    %57 = vector.broadcast %cst_24 : f32 to vector<8x32xf32>
    %58 = arith.addf %57, %56 : vector<8x32xf32>
    %59 = arith.divf %57, %58 : vector<8x32xf32>
    %60 = vector.extract_strided_slice %27 {offsets = [0, 160], sizes = [8, 32], strides = [1, 1]} : vector<8x1024xf32> to vector<8x32xf32>
    %61 = vector.extract_strided_slice %51 {offsets = [0, 32], sizes = [8, 32], strides = [1, 1]} : vector<8x96xf32> to vector<8x32xf32>
    %62 = arith.addf %60, %61 : vector<8x32xf32>
    %63 = arith.negf %62 : vector<8x32xf32>
    %64 = math.exp %63 : vector<8x32xf32>
    %cst_25 = arith.constant 1.000000e+00 : f32
    %65 = vector.broadcast %cst_25 : f32 to vector<8x32xf32>
    %66 = arith.addf %65, %64 : vector<8x32xf32>
    %67 = arith.divf %65, %66 : vector<8x32xf32>
    %68 = vector.extract_strided_slice %27 {offsets = [0, 192], sizes = [8, 32], strides = [1, 1]} : vector<8x1024xf32> to vector<8x32xf32>
    %69 = vector.extract_strided_slice %51 {offsets = [0, 64], sizes = [8, 32], strides = [1, 1]} : vector<8x96xf32> to vector<8x32xf32>
    %70 = arith.addf %69, %31 : vector<8x32xf32>
    %71 = arith.mulf %59, %70 : vector<8x32xf32>
    %72 = arith.addf %68, %71 : vector<8x32xf32>
    %73 = math.tanh %72 : vector<8x32xf32>
    %cst_26 = arith.constant 1.000000e+00 : f32
    %74 = vector.broadcast %cst_26 : f32 to vector<8x32xf32>
    %75 = arith.subf %74, %67 : vector<8x32xf32>
    %76 = arith.mulf %75, %73 : vector<8x32xf32>
    %77 = arith.mulf %67, %50 : vector<8x32xf32>
    %78 = arith.addf %76, %77 : vector<8x32xf32>
    %cst_27 = arith.constant dense<0.000000e+00> : vector<8x96xf32>
    %79 = tpu.matmul %78, %28, %cst_27 {dimension_numbers = #tpu.dot_dimension_numbers<[1], [0], [0], [1], [0, 0, 1, 1], [], []>} : vector<8x32xf32>, vector<32x96xf32>, vector<8x96xf32> -> vector<8x96xf32>
    %80 = vector.extract_strided_slice %27 {offsets = [0, 256], sizes = [8, 32], strides = [1, 1]} : vector<8x1024xf32> to vector<8x32xf32>
    %81 = vector.extract_strided_slice %79 {offsets = [0, 0], sizes = [8, 32], strides = [1, 1]} : vector<8x96xf32> to vector<8x32xf32>
    %82 = arith.addf %80, %81 : vector<8x32xf32>
    %83 = arith.negf %82 : vector<8x32xf32>
    %84 = math.exp %83 : vector<8x32xf32>
    %cst_28 = arith.constant 1.000000e+00 : f32
    %85 = vector.broadcast %cst_28 : f32 to vector<8x32xf32>
    %86 = arith.addf %85, %84 : vector<8x32xf32>
    %87 = arith.divf %85, %86 : vector<8x32xf32>
    %88 = vector.extract_strided_slice %27 {offsets = [0, 288], sizes = [8, 32], strides = [1, 1]} : vector<8x1024xf32> to vector<8x32xf32>
    %89 = vector.extract_strided_slice %79 {offsets = [0, 32], sizes = [8, 32], strides = [1, 1]} : vector<8x96xf32> to vector<8x32xf32>
    %90 = arith.addf %88, %89 : vector<8x32xf32>
    %91 = arith.negf %90 : vector<8x32xf32>
    %92 = math.exp %91 : vector<8x32xf32>
    %cst_29 = arith.constant 1.000000e+00 : f32
    %93 = vector.broadcast %cst_29 : f32 to vector<8x32xf32>
    %94 = arith.addf %93, %92 : vector<8x32xf32>
    %95 = arith.divf %93, %94 : vector<8x32xf32>
    %96 = vector.extract_strided_slice %27 {offsets = [0, 320], sizes = [8, 32], strides = [1, 1]} : vector<8x1024xf32> to vector<8x32xf32>
    %97 = vector.extract_strided_slice %79 {offsets = [0, 64], sizes = [8, 32], strides = [1, 1]} : vector<8x96xf32> to vector<8x32xf32>
    %98 = arith.addf %97, %31 : vector<8x32xf32>
    %99 = arith.mulf %87, %98 : vector<8x32xf32>
    %100 = arith.addf %96, %99 : vector<8x32xf32>
    %101 = math.tanh %100 : vector<8x32xf32>
    %cst_30 = arith.constant 1.000000e+00 : f32
    %102 = vector.broadcast %cst_30 : f32 to vector<8x32xf32>
    %103 = arith.subf %102, %95 : vector<8x32xf32>
    %104 = arith.mulf %103, %101 : vector<8x32xf32>
    %105 = arith.mulf %95, %78 : vector<8x32xf32>
    %106 = arith.addf %104, %105 : vector<8x32xf32>
    %cst_31 = arith.constant dense<0.000000e+00> : vector<8x96xf32>
    %107 = tpu.matmul %106, %28, %cst_31 {dimension_numbers = #tpu.dot_dimension_numbers<[1], [0], [0], [1], [0, 0, 1, 1], [], []>} : vector<8x32xf32>, vector<32x96xf32>, vector<8x96xf32> -> vector<8x96xf32>
    %108 = vector.extract_strided_slice %27 {offsets = [0, 384], sizes = [8, 32], strides = [1, 1]} : vector<8x1024xf32> to vector<8x32xf32>
    %109 = vector.extract_strided_slice %107 {offsets = [0, 0], sizes = [8, 32], strides = [1, 1]} : vector<8x96xf32> to vector<8x32xf32>
    %110 = arith.addf %108, %109 : vector<8x32xf32>
    %111 = arith.negf %110 : vector<8x32xf32>
    %112 = math.exp %111 : vector<8x32xf32>
    %cst_32 = arith.constant 1.000000e+00 : f32
    %113 = vector.broadcast %cst_32 : f32 to vector<8x32xf32>
    %114 = arith.addf %113, %112 : vector<8x32xf32>
    %115 = arith.divf %113, %114 : vector<8x32xf32>
    %116 = vector.extract_strided_slice %27 {offsets = [0, 416], sizes = [8, 32], strides = [1, 1]} : vector<8x1024xf32> to vector<8x32xf32>
    %117 = vector.extract_strided_slice %107 {offsets = [0, 32], sizes = [8, 32], strides = [1, 1]} : vector<8x96xf32> to vector<8x32xf32>
    %118 = arith.addf %116, %117 : vector<8x32xf32>
    %119 = arith.negf %118 : vector<8x32xf32>
    %120 = math.exp %119 : vector<8x32xf32>
    %cst_33 = arith.constant 1.000000e+00 : f32
    %121 = vector.broadcast %cst_33 : f32 to vector<8x32xf32>
    %122 = arith.addf %121, %120 : vector<8x32xf32>
    %123 = arith.divf %121, %122 : vector<8x32xf32>
    %124 = vector.extract_strided_slice %27 {offsets = [0, 448], sizes = [8, 32], strides = [1, 1]} : vector<8x1024xf32> to vector<8x32xf32>
    %125 = vector.extract_strided_slice %107 {offsets = [0, 64], sizes = [8, 32], strides = [1, 1]} : vector<8x96xf32> to vector<8x32xf32>
    %126 = arith.addf %125, %31 : vector<8x32xf32>
    %127 = arith.mulf %115, %126 : vector<8x32xf32>
    %128 = arith.addf %124, %127 : vector<8x32xf32>
    %129 = math.tanh %128 : vector<8x32xf32>
    %cst_34 = arith.constant 1.000000e+00 : f32
    %130 = vector.broadcast %cst_34 : f32 to vector<8x32xf32>
    %131 = arith.subf %130, %123 : vector<8x32xf32>
    %132 = arith.mulf %131, %129 : vector<8x32xf32>
    %133 = arith.mulf %123, %106 : vector<8x32xf32>
    %134 = arith.addf %132, %133 : vector<8x32xf32>
    %cst_35 = arith.constant dense<0.000000e+00> : vector<8x96xf32>
    %135 = tpu.matmul %134, %28, %cst_35 {dimension_numbers = #tpu.dot_dimension_numbers<[1], [0], [0], [1], [0, 0, 1, 1], [], []>} : vector<8x32xf32>, vector<32x96xf32>, vector<8x96xf32> -> vector<8x96xf32>
    %136 = vector.extract_strided_slice %27 {offsets = [0, 512], sizes = [8, 32], strides = [1, 1]} : vector<8x1024xf32> to vector<8x32xf32>
    %137 = vector.extract_strided_slice %135 {offsets = [0, 0], sizes = [8, 32], strides = [1, 1]} : vector<8x96xf32> to vector<8x32xf32>
    %138 = arith.addf %136, %137 : vector<8x32xf32>
    %139 = arith.negf %138 : vector<8x32xf32>
    %140 = math.exp %139 : vector<8x32xf32>
    %cst_36 = arith.constant 1.000000e+00 : f32
    %141 = vector.broadcast %cst_36 : f32 to vector<8x32xf32>
    %142 = arith.addf %141, %140 : vector<8x32xf32>
    %143 = arith.divf %141, %142 : vector<8x32xf32>
    %144 = vector.extract_strided_slice %27 {offsets = [0, 544], sizes = [8, 32], strides = [1, 1]} : vector<8x1024xf32> to vector<8x32xf32>
    %145 = vector.extract_strided_slice %135 {offsets = [0, 32], sizes = [8, 32], strides = [1, 1]} : vector<8x96xf32> to vector<8x32xf32>
    %146 = arith.addf %144, %145 : vector<8x32xf32>
    %147 = arith.negf %146 : vector<8x32xf32>
    %148 = math.exp %147 : vector<8x32xf32>
    %cst_37 = arith.constant 1.000000e+00 : f32
    %149 = vector.broadcast %cst_37 : f32 to vector<8x32xf32>
    %150 = arith.addf %149, %148 : vector<8x32xf32>
    %151 = arith.divf %149, %150 : vector<8x32xf32>
    %152 = vector.extract_strided_slice %27 {offsets = [0, 576], sizes = [8, 32], strides = [1, 1]} : vector<8x1024xf32> to vector<8x32xf32>
    %153 = vector.extract_strided_slice %135 {offsets = [0, 64], sizes = [8, 32], strides = [1, 1]} : vector<8x96xf32> to vector<8x32xf32>
    %154 = arith.addf %153, %31 : vector<8x32xf32>
    %155 = arith.mulf %143, %154 : vector<8x32xf32>
    %156 = arith.addf %152, %155 : vector<8x32xf32>
    %157 = math.tanh %156 : vector<8x32xf32>
    %cst_38 = arith.constant 1.000000e+00 : f32
    %158 = vector.broadcast %cst_38 : f32 to vector<8x32xf32>
    %159 = arith.subf %158, %151 : vector<8x32xf32>
    %160 = arith.mulf %159, %157 : vector<8x32xf32>
    %161 = arith.mulf %151, %134 : vector<8x32xf32>
    %162 = arith.addf %160, %161 : vector<8x32xf32>
    %cst_39 = arith.constant dense<0.000000e+00> : vector<8x96xf32>
    %163 = tpu.matmul %162, %28, %cst_39 {dimension_numbers = #tpu.dot_dimension_numbers<[1], [0], [0], [1], [0, 0, 1, 1], [], []>} : vector<8x32xf32>, vector<32x96xf32>, vector<8x96xf32> -> vector<8x96xf32>
    %164 = vector.extract_strided_slice %27 {offsets = [0, 640], sizes = [8, 32], strides = [1, 1]} : vector<8x1024xf32> to vector<8x32xf32>
    %165 = vector.extract_strided_slice %163 {offsets = [0, 0], sizes = [8, 32], strides = [1, 1]} : vector<8x96xf32> to vector<8x32xf32>
    %166 = arith.addf %164, %165 : vector<8x32xf32>
    %167 = arith.negf %166 : vector<8x32xf32>
    %168 = math.exp %167 : vector<8x32xf32>
    %cst_40 = arith.constant 1.000000e+00 : f32
    %169 = vector.broadcast %cst_40 : f32 to vector<8x32xf32>
    %170 = arith.addf %169, %168 : vector<8x32xf32>
    %171 = arith.divf %169, %170 : vector<8x32xf32>
    %172 = vector.extract_strided_slice %27 {offsets = [0, 672], sizes = [8, 32], strides = [1, 1]} : vector<8x1024xf32> to vector<8x32xf32>
    %173 = vector.extract_strided_slice %163 {offsets = [0, 32], sizes = [8, 32], strides = [1, 1]} : vector<8x96xf32> to vector<8x32xf32>
    %174 = arith.addf %172, %173 : vector<8x32xf32>
    %175 = arith.negf %174 : vector<8x32xf32>
    %176 = math.exp %175 : vector<8x32xf32>
    %cst_41 = arith.constant 1.000000e+00 : f32
    %177 = vector.broadcast %cst_41 : f32 to vector<8x32xf32>
    %178 = arith.addf %177, %176 : vector<8x32xf32>
    %179 = arith.divf %177, %178 : vector<8x32xf32>
    %180 = vector.extract_strided_slice %27 {offsets = [0, 704], sizes = [8, 32], strides = [1, 1]} : vector<8x1024xf32> to vector<8x32xf32>
    %181 = vector.extract_strided_slice %163 {offsets = [0, 64], sizes = [8, 32], strides = [1, 1]} : vector<8x96xf32> to vector<8x32xf32>
    %182 = arith.addf %181, %31 : vector<8x32xf32>
    %183 = arith.mulf %171, %182 : vector<8x32xf32>
    %184 = arith.addf %180, %183 : vector<8x32xf32>
    %185 = math.tanh %184 : vector<8x32xf32>
    %cst_42 = arith.constant 1.000000e+00 : f32
    %186 = vector.broadcast %cst_42 : f32 to vector<8x32xf32>
    %187 = arith.subf %186, %179 : vector<8x32xf32>
    %188 = arith.mulf %187, %185 : vector<8x32xf32>
    %189 = arith.mulf %179, %162 : vector<8x32xf32>
    %190 = arith.addf %188, %189 : vector<8x32xf32>
    %cst_43 = arith.constant dense<0.000000e+00> : vector<8x96xf32>
    %191 = tpu.matmul %190, %28, %cst_43 {dimension_numbers = #tpu.dot_dimension_numbers<[1], [0], [0], [1], [0, 0, 1, 1], [], []>} : vector<8x32xf32>, vector<32x96xf32>, vector<8x96xf32> -> vector<8x96xf32>
    %192 = vector.extract_strided_slice %27 {offsets = [0, 768], sizes = [8, 32], strides = [1, 1]} : vector<8x1024xf32> to vector<8x32xf32>
    %193 = vector.extract_strided_slice %191 {offsets = [0, 0], sizes = [8, 32], strides = [1, 1]} : vector<8x96xf32> to vector<8x32xf32>
    %194 = arith.addf %192, %193 : vector<8x32xf32>
    %195 = arith.negf %194 : vector<8x32xf32>
    %196 = math.exp %195 : vector<8x32xf32>
    %cst_44 = arith.constant 1.000000e+00 : f32
    %197 = vector.broadcast %cst_44 : f32 to vector<8x32xf32>
    %198 = arith.addf %197, %196 : vector<8x32xf32>
    %199 = arith.divf %197, %198 : vector<8x32xf32>
    %200 = vector.extract_strided_slice %27 {offsets = [0, 800], sizes = [8, 32], strides = [1, 1]} : vector<8x1024xf32> to vector<8x32xf32>
    %201 = vector.extract_strided_slice %191 {offsets = [0, 32], sizes = [8, 32], strides = [1, 1]} : vector<8x96xf32> to vector<8x32xf32>
    %202 = arith.addf %200, %201 : vector<8x32xf32>
    %203 = arith.negf %202 : vector<8x32xf32>
    %204 = math.exp %203 : vector<8x32xf32>
    %cst_45 = arith.constant 1.000000e+00 : f32
    %205 = vector.broadcast %cst_45 : f32 to vector<8x32xf32>
    %206 = arith.addf %205, %204 : vector<8x32xf32>
    %207 = arith.divf %205, %206 : vector<8x32xf32>
    %208 = vector.extract_strided_slice %27 {offsets = [0, 832], sizes = [8, 32], strides = [1, 1]} : vector<8x1024xf32> to vector<8x32xf32>
    %209 = vector.extract_strided_slice %191 {offsets = [0, 64], sizes = [8, 32], strides = [1, 1]} : vector<8x96xf32> to vector<8x32xf32>
    %210 = arith.addf %209, %31 : vector<8x32xf32>
    %211 = arith.mulf %199, %210 : vector<8x32xf32>
    %212 = arith.addf %208, %211 : vector<8x32xf32>
    %213 = math.tanh %212 : vector<8x32xf32>
    %cst_46 = arith.constant 1.000000e+00 : f32
    %214 = vector.broadcast %cst_46 : f32 to vector<8x32xf32>
    %215 = arith.subf %214, %207 : vector<8x32xf32>
    %216 = arith.mulf %215, %213 : vector<8x32xf32>
    %217 = arith.mulf %207, %190 : vector<8x32xf32>
    %218 = arith.addf %216, %217 : vector<8x32xf32>
    %cst_47 = arith.constant dense<0.000000e+00> : vector<8x96xf32>
    %219 = tpu.matmul %218, %28, %cst_47 {dimension_numbers = #tpu.dot_dimension_numbers<[1], [0], [0], [1], [0, 0, 1, 1], [], []>} : vector<8x32xf32>, vector<32x96xf32>, vector<8x96xf32> -> vector<8x96xf32>
    %220 = vector.extract_strided_slice %27 {offsets = [0, 896], sizes = [8, 32], strides = [1, 1]} : vector<8x1024xf32> to vector<8x32xf32>
    %221 = vector.extract_strided_slice %219 {offsets = [0, 0], sizes = [8, 32], strides = [1, 1]} : vector<8x96xf32> to vector<8x32xf32>
    %222 = arith.addf %220, %221 : vector<8x32xf32>
    %223 = arith.negf %222 : vector<8x32xf32>
    %224 = math.exp %223 : vector<8x32xf32>
    %cst_48 = arith.constant 1.000000e+00 : f32
    %225 = vector.broadcast %cst_48 : f32 to vector<8x32xf32>
    %226 = arith.addf %225, %224 : vector<8x32xf32>
    %227 = arith.divf %225, %226 : vector<8x32xf32>
    %228 = vector.extract_strided_slice %27 {offsets = [0, 928], sizes = [8, 32], strides = [1, 1]} : vector<8x1024xf32> to vector<8x32xf32>
    %229 = vector.extract_strided_slice %219 {offsets = [0, 32], sizes = [8, 32], strides = [1, 1]} : vector<8x96xf32> to vector<8x32xf32>
    %230 = arith.addf %228, %229 : vector<8x32xf32>
    %231 = arith.negf %230 : vector<8x32xf32>
    %232 = math.exp %231 : vector<8x32xf32>
    %cst_49 = arith.constant 1.000000e+00 : f32
    %233 = vector.broadcast %cst_49 : f32 to vector<8x32xf32>
    %234 = arith.addf %233, %232 : vector<8x32xf32>
    %235 = arith.divf %233, %234 : vector<8x32xf32>
    %236 = vector.extract_strided_slice %27 {offsets = [0, 960], sizes = [8, 32], strides = [1, 1]} : vector<8x1024xf32> to vector<8x32xf32>
    %237 = vector.extract_strided_slice %219 {offsets = [0, 64], sizes = [8, 32], strides = [1, 1]} : vector<8x96xf32> to vector<8x32xf32>
    %238 = arith.addf %237, %31 : vector<8x32xf32>
    %239 = arith.mulf %227, %238 : vector<8x32xf32>
    %240 = arith.addf %236, %239 : vector<8x32xf32>
    %241 = math.tanh %240 : vector<8x32xf32>
    %cst_50 = arith.constant 1.000000e+00 : f32
    %242 = vector.broadcast %cst_50 : f32 to vector<8x32xf32>
    %243 = arith.subf %242, %235 : vector<8x32xf32>
    %244 = arith.mulf %243, %241 : vector<8x32xf32>
    %245 = arith.mulf %235, %218 : vector<8x32xf32>
    %246 = arith.addf %244, %245 : vector<8x32xf32>
    %247 = math.tanh %246 : vector<8x32xf32>
    %248 = arith.mulf %1, %4 : vector<8x2xf32>
    %c0_51 = arith.constant 0 : index
    %c0_52 = arith.constant 0 : index
    %249 = vector.load %arg10[%c0_51, %c0_52] : memref<2x16xf32, #tpu.memory_space<vmem>>, vector<2x16xf32>
    %cst_53 = arith.constant dense<0.000000e+00> : vector<8x16xf32>
    %250 = tpu.matmul %248, %249, %cst_53 {dimension_numbers = #tpu.dot_dimension_numbers<[1], [0], [0], [1], [0, 0, 1, 1], [], []>} : vector<8x2xf32>, vector<2x16xf32>, vector<8x16xf32> -> vector<8x16xf32>
    %251 = arith.mulf %22, %5 : vector<8x32xf32>
    %c0_54 = arith.constant 0 : index
    %c0_55 = arith.constant 0 : index
    %252 = vector.load %arg11[%c0_54, %c0_55] : memref<32x16xf32, #tpu.memory_space<vmem>>, vector<32x16xf32>
    %cst_56 = arith.constant dense<0.000000e+00> : vector<8x16xf32>
    %253 = tpu.matmul %251, %252, %cst_56 {dimension_numbers = #tpu.dot_dimension_numbers<[1], [0], [0], [1], [0, 0, 1, 1], [], []>} : vector<8x32xf32>, vector<32x16xf32>, vector<8x16xf32> -> vector<8x16xf32>
    %254 = arith.addf %250, %253 : vector<8x16xf32>
    %255 = arith.mulf %247, %6 : vector<8x32xf32>
    %c0_57 = arith.constant 0 : index
    %c0_58 = arith.constant 0 : index
    %256 = vector.load %arg12[%c0_57, %c0_58] : memref<32x16xf32, #tpu.memory_space<vmem>>, vector<32x16xf32>
    %cst_59 = arith.constant dense<0.000000e+00> : vector<8x16xf32>
    %257 = tpu.matmul %255, %256, %cst_59 {dimension_numbers = #tpu.dot_dimension_numbers<[1], [0], [0], [1], [0, 0, 1, 1], [], []>} : vector<8x32xf32>, vector<32x16xf32>, vector<8x16xf32> -> vector<8x16xf32>
    %258 = arith.addf %254, %257 : vector<8x16xf32>
    %c0_60 = arith.constant 0 : index
    %c0_61 = arith.constant 0 : index
    %259 = vector.load %arg13[%c0_60, %c0_61] : memref<1x16xf32, #tpu.memory_space<vmem>>, vector<1x16xf32>
    %260 = vector.broadcast %259 : vector<1x16xf32> to vector<8x16xf32>
    %261 = arith.addf %258, %260 : vector<8x16xf32>
    %262 = math.tanh %261 : vector<8x16xf32>
    %c0_62 = arith.constant 0 : index
    %c0_63 = arith.constant 0 : index
    %263 = vector.load %arg14[%c0_62, %c0_63] : memref<16x128xf32, #tpu.memory_space<vmem>>, vector<16x128xf32>
    %cst_64 = arith.constant dense<0.000000e+00> : vector<8x128xf32>
    %264 = tpu.matmul %262, %263, %cst_64 {dimension_numbers = #tpu.dot_dimension_numbers<[1], [0], [0], [1], [0, 0, 1, 1], [], []>} : vector<8x16xf32>, vector<16x128xf32>, vector<8x128xf32> -> vector<8x128xf32>
    %c0_65 = arith.constant 0 : index
    %c0_66 = arith.constant 0 : index
    %265 = vector.load %arg15[%c0_65, %c0_66] : memref<1x128xf32, #tpu.memory_space<vmem>>, vector<1x128xf32>
    %266 = vector.broadcast %265 : vector<1x128xf32> to vector<8x128xf32>
    %267 = arith.addf %264, %266 : vector<8x128xf32>
    %268 = math.tanh %267 : vector<8x128xf32>
    %c0_67 = arith.constant 0 : index
    %c0_68 = arith.constant 0 : index
    %269 = vector.load %arg16[%c0_67, %c0_68] : memref<8x128xf32, #tpu.memory_space<vmem>>, vector<8x128xf32>
    tpu.vector_store %arg16[%c0_67, %c0_68], %268 {strides = array<i32>} : memref<8x128xf32, #tpu.memory_space<vmem>>, vector<8x128xf32>,
    return
  }
  func.func @transform_0(%arg0: i32) -> (i32, i32) {
    %c0_i32 = arith.constant 0 : i32
    %c0_i32_0 = arith.constant 0 : i32
    return %arg0, %c0_i32 : i32, i32
  }
  func.func @transform_1(%arg0: i32) -> (i32, i32) {
    %c0_i32 = arith.constant 0 : i32
    %c0_i32_0 = arith.constant 0 : i32
    %c0_i32_1 = arith.constant 0 : i32
    return %c0_i32, %c0_i32_0 : i32, i32
  }
  func.func @transform_2(%arg0: i32) -> (i32, i32) {
    %c0_i32 = arith.constant 0 : i32
    %c0_i32_0 = arith.constant 0 : i32
    %c0_i32_1 = arith.constant 0 : i32
    return %c0_i32, %c0_i32_0 : i32, i32
  }
  func.func @transform_3(%arg0: i32) -> (i32, i32) {
    %c0_i32 = arith.constant 0 : i32
    %c0_i32_0 = arith.constant 0 : i32
    %c0_i32_1 = arith.constant 0 : i32
    return %c0_i32, %c0_i32_0 : i32, i32
  }
  func.func @transform_4(%arg0: i32) -> (i32, i32) {
    %c0_i32 = arith.constant 0 : i32
    %c0_i32_0 = arith.constant 0 : i32
    %c0_i32_1 = arith.constant 0 : i32
    return %c0_i32, %c0_i32_0 : i32, i32
  }
  func.func @transform_5(%arg0: i32) -> (i32, i32) {
    %c0_i32 = arith.constant 0 : i32
    %c0_i32_0 = arith.constant 0 : i32
    %c0_i32_1 = arith.constant 0 : i32
    return %c0_i32, %c0_i32_0 : i32, i32
  }
  func.func @transform_6(%arg0: i32) -> (i32, i32) {
    %c0_i32 = arith.constant 0 : i32
    %c0_i32_0 = arith.constant 0 : i32
    %c0_i32_1 = arith.constant 0 : i32
    return %c0_i32, %c0_i32_0 : i32, i32
  }
  func.func @transform_7(%arg0: i32) -> (i32, i32) {
    %c0_i32 = arith.constant 0 : i32
    %c0_i32_0 = arith.constant 0 : i32
    %c0_i32_1 = arith.constant 0 : i32
    return %c0_i32, %c0_i32_0 : i32, i32
  }
  func.func @transform_8(%arg0: i32) -> (i32, i32) {
    %c0_i32 = arith.constant 0 : i32
    %c0_i32_0 = arith.constant 0 : i32
    %c0_i32_1 = arith.constant 0 : i32
    return %c0_i32, %c0_i32_0 : i32, i32
  }
  func.func @transform_9(%arg0: i32) -> (i32, i32) {
    %c0_i32 = arith.constant 0 : i32
    %c0_i32_0 = arith.constant 0 : i32
    %c0_i32_1 = arith.constant 0 : i32
    return %c0_i32, %c0_i32_0 : i32, i32
  }
  func.func @transform_10(%arg0: i32) -> (i32, i32) {
    %c0_i32 = arith.constant 0 : i32
    %c0_i32_0 = arith.constant 0 : i32
    %c0_i32_1 = arith.constant 0 : i32
    return %c0_i32, %c0_i32_0 : i32, i32
  }
  func.func @transform_11(%arg0: i32) -> (i32, i32) {
    %c0_i32 = arith.constant 0 : i32
    %c0_i32_0 = arith.constant 0 : i32
    %c0_i32_1 = arith.constant 0 : i32
    return %c0_i32, %c0_i32_0 : i32, i32
  }
  func.func @transform_12(%arg0: i32) -> (i32, i32) {
    %c0_i32 = arith.constant 0 : i32
    %c0_i32_0 = arith.constant 0 : i32
    %c0_i32_1 = arith.constant 0 : i32
    return %c0_i32, %c0_i32_0 : i32, i32
  }
  func.func @transform_13(%arg0: i32) -> (i32, i32) {
    %c0_i32 = arith.constant 0 : i32
    %c0_i32_0 = arith.constant 0 : i32
    %c0_i32_1 = arith.constant 0 : i32
    return %c0_i32, %c0_i32_0 : i32, i32
  }
  func.func @transform_14(%arg0: i32) -> (i32, i32) {
    %c0_i32 = arith.constant 0 : i32
    %c0_i32_0 = arith.constant 0 : i32
    %c0_i32_1 = arith.constant 0 : i32
    return %c0_i32, %c0_i32_0 : i32, i32
  }
  func.func @transform_15(%arg0: i32) -> (i32, i32) {
    %c0_i32 = arith.constant 0 : i32
    %c0_i32_0 = arith.constant 0 : i32
    return %arg0, %c0_i32 : i32, i32
  }
}

</mosaic_0001>

<bundles_post_ra>
// kernel: tpu_custom_call.1
= control target key start
LH: loop header
LB: loop body
LE: loop exit
PB: predicated region body
PF: predicated region fallthrough
CT: control target
= control target key end

     0   :  { %20 = vsyncpa [#allocation3], 0  ;;  %s2629_s0 = inlined_call_operand.vmem [shape: f32[8,124], index: 0, kind: input, shape index: {}]   ;;  %s2630_s1 = inlined_call_operand.hbm [shape: f32[32,1024], index: 1, kind: input, shape index: {}]   ;;  %s2631_s2 = inlined_call_operand.hbm [shape: f32[1,1024], index: 2, kind: input, shape index: {}]   ;;  %s2632_s3 = inlined_call_operand.vmem [shape: f32[32,96], index: 3, kind: input, shape index: {}]   ;;  %s2633_s4 = inlined_call_operand.hbm [shape: f32[1,32], index: 4, kind: input, shape index: {}]   ;;  %s2634_s5 = inlined_call_operand.vmem [shape: f32[24,32], index: 5, kind: input, shape index: {}]   ;;  %s2635_s6 = inlined_call_operand.hbm [shape: f32[1,32], index: 6, kind: input, shape index: {}]   ;;  %s2636_s7 = inlined_call_operand.vmem [shape: f32[32,32], index: 7, kind: input, shape index: {}]   ;;  %s2637_s8 = inlined_call_operand.hbm [shape: f32[1,32], index: 8, kind: input, shape index: {}]   ;;  %s2638_s9 = inlined_call_operand.vmem [shape: f32[2,16], index: 9, kind: input, shape index: {}]   ;;  %s2639_s10 = inlined_call_operand.vmem [shape: f32[32,16], index: 10, kind: input, shape index: {}]   ;;  %s2640_s11 = inlined_call_operand.vmem [shape: f32[32,16], index: 11, kind: input, shape index: {}]   ;;  %s2641_s12 = inlined_call_operand.vmem [shape: f32[1,16], index: 12, kind: input, shape index: {}]   ;;  %s2642_s13 = inlined_call_operand.hbm [shape: f32[16,128], index: 13, kind: input, shape index: {}]   ;;  %s2643_s14 = inlined_call_operand.vmem [shape: f32[1,128], index: 14, kind: input, shape index: {}]   ;;  %s2644_s15 = inlined_call_operand.hbm [shape: f32[8,128], index: 15, kind: output, shape index: {}]  }
   0x1   :  { %21 = vsyncpa [#allocation6], 0 }
   0x2   :  { %22 = vsyncpa [#allocation9], 0 }
   0x3   :  { %23 = vsyncpa [#allocation12], 0 }
   0x4   :  { %24 = vsyncpa [#allocation4], 0  ;;  %s2221_s18 = smov [#allocation5]   ;;  %s2222_s20 = smov [#allocation8]  }
   0x5   :  { %s45_s19 = sshll.u32 %s2221_s18, 4  ;;  %s69_s21 = sshll.u32 %s2222_s20, 4  ;;  %s46_s19 = int_to_ptr.vmem [resolvable:$true] %s45_s19  ;;  %s70_s21 = int_to_ptr.vmem [resolvable:$true] %s69_s21 }
   0x6   :  { %s2079_s22 = scalar_lea.vmem %s46_s19, 128  ;;  %p2084_p1 = scmp.lt.s32.totalorder %s46_s19, %s46_s19 }
   0x7   :  { %p2080_p0 = scmp.ne.s32.totalorder %s46_s19, %s2079_s22  ;;  %p2085_p2 = scmp.lt.s32.totalorder %s2079_s22, %s2079_s22 }
   0x9   :  { %p2086_p3 = por %p2085_p2, %p2084_p1 }
   0xb   :  { %p2087_p4 = pnand %p2086_p3, %p2080_p0 }
   0xd   :  { %2090 = shalt.err (!%p2087_p4)
}
   0xe   :  { %48 = dma.hbm_to_vmem [thread:$0]  %s2631_s2, 128, %s46_s19, [#allocation6]  }
   0xf   :  { %s2099_s25 = scalar_lea.vmem %s70_s21, 16  ;;  %s2103_s26 = scalar_lea.vmem %s70_s21, 32 }
  0x10   :  { %p2100_p5 = scmp.ne.s32.totalorder %s70_s21, %s2099_s25  ;;  %p2104_p6 = scmp.lt.s32.totalorder %s70_s21, %s70_s21 }
  0x11   :  { %p2105_p7 = scmp.lt.s32.totalorder %s2103_s26, %s2099_s25 }
  0x13   :  { %p2106_p8 = por %p2105_p7, %p2104_p6 }
  0x15   :  { %p2107_p9 = pnand %p2106_p8, %p2100_p5 }
  0x17   :  { %2110 = shalt.err (!%p2107_p9)
}
  0x18   :  { %72 = dma.hbm_to_vmem [thread:$0]  %s2635_s6, 16, %s70_s21, [#allocation9]  }
  0x19   :  { %s2223_s29 = smov [#allocation2]  }
  0x1a   :  { %s32_s30 = sshll.u32 %s2223_s29, 4  ;;  %s33_s30 = int_to_ptr.vmem [resolvable:$true] %s32_s30 }
  0x1b   :  { %s2119_s16 = scalar_lea.vmem %s33_s30, 4096  ;;  %p2124_p11 = scmp.lt.s32.totalorder %s33_s30, %s33_s30 }
  0x1c   :  { %p2120_p10 = scmp.ne.s32.totalorder %s33_s30, %s2119_s16  ;;  %p2125_p12 = scmp.lt.s32.totalorder %s2119_s16, %s2119_s16 }
  0x1e   :  { %p2126_p13 = por %p2125_p12, %p2124_p11 }
  0x20   :  { %p2127_p0 = pnand %p2126_p13, %p2120_p10 }
  0x22   :  { %2130 = shalt.err (!%p2127_p0)
}
  0x23   :  { %s2224_s2 = smov 1024   ;;  %s2225_s17 = smov 64  }
  0x24   :  { %38 = dma.hbm_to_vmem [thread:$0]  %s2630_s1, 4096, %s33_s30, [#allocation3], %s2224_s2, %s2224_s2, %s2225_s17  }
  0x25   :  { %s2226_s20 = smov [#allocation7]   ;;  %s2227_s6 = smov [#allocation10]  }
  0x26   :  { %s57_s22 = sshll.u32 %s2226_s20, 4  ;;  %s81_s21 = sshll.u32 %s2227_s6, 4  ;;  %s58_s22 = int_to_ptr.vmem [resolvable:$true] %s57_s22  ;;  %s82_s21 = int_to_ptr.vmem [resolvable:$true] %s81_s21 }
  0x27   :  { %s2139_s23 = scalar_lea.vmem %s58_s22, 16  ;;  %s2143_s24 = scalar_lea.vmem %s58_s22, 32 }
  0x28   :  { %p2140_p1 = scmp.ne.s32.totalorder %s58_s22, %s2139_s23  ;;  %p2144_p2 = scmp.lt.s32.totalorder %s58_s22, %s58_s22 }
  0x29   :  { %p2145_p3 = scmp.lt.s32.totalorder %s2143_s24, %s2139_s23 }
  0x2b   :  { %p2146_p4 = por %p2145_p3, %p2144_p2 }
  0x2d   :  { %p2147_p5 = pnand %p2146_p4, %p2140_p1 }
  0x2f   :  { %2150 = shalt.err (!%p2147_p5)
}
  0x30   :  { %60 = dma.hbm_to_vmem [thread:$0]  %s2633_s4, 16, %s58_s22, [#allocation6]  }
  0x31   :  { %s2159_s27 = scalar_lea.vmem %s82_s21, 16  ;;  %s2163_s1 = scalar_lea.vmem %s82_s21, 32 }
  0x32   :  { %p2160_p6 = scmp.ne.s32.totalorder %s82_s21, %s2159_s27  ;;  %p2164_p7 = scmp.lt.s32.totalorder %s82_s21, %s82_s21 }
  0x33   :  { %p2165_p8 = scmp.lt.s32.totalorder %s2163_s1, %s2159_s27 }
  0x35   :  { %p2166_p9 = por %p2165_p8, %p2164_p7 }
  0x37   :  { %p2167_p10 = pnand %p2166_p9, %p2160_p6 }
  0x39   :  { %2170 = shalt.err (!%p2167_p10)
}
  0x3a   :  { %84 = dma.hbm_to_vmem [thread:$0]  %s2637_s8, 16, %s82_s21, [#allocation9]  }
  0x3b   :  { %s2228_s30 = smov [#allocation11]  }
  0x3c   :  { %s98_s16 = sshll.u32 %s2228_s30, 4  ;;  %s99_s16 = int_to_ptr.vmem [resolvable:$true] %s98_s16 }
  0x3d   :  { %s2179_s2 = scalar_lea.vmem %s99_s16, 256  ;;  %p2184_p12 = scmp.lt.s32.totalorder %s99_s16, %s99_s16 }
  0x3e   :  { %p2180_p11 = scmp.ne.s32.totalorder %s99_s16, %s2179_s2  ;;  %p2185_p13 = scmp.lt.s32.totalorder %s2179_s2, %s2179_s2 }
  0x40   :  { %p2186_p0 = por %p2185_p13, %p2184_p12 }
  0x42   :  { %p2187_p1 = pnand %p2186_p0, %p2180_p11 }
  0x44   :  { %2190 = shalt.err (!%p2187_p1)
}
  0x45   :  { %s2229_s4 = smov 128   ;;  %s2230_s18 = smov 8  }
  0x46   :  { %104 = dma.hbm_to_vmem [thread:$0]  %s2642_s13, 256, %s99_s16, [#allocation12], %s2229_s4, %s2229_s4, %s2230_s18  }
  0x47   :  { %2211 = dma.done.wait [#allocation3], 4096  }
  0x48   :  { %2212 = vsyncadd [#allocation3], 4294963200 }
  0x49   :  { %2213 = dma.done.wait [#allocation6], 144  }
  0x4a   :  { %2214 = vsyncadd [#allocation6], 4294967152 }
  0x4b   :  { %2215 = dma.done.wait [#allocation9], 32  }
  0x4c   :  { %2216 = vsyncadd [#allocation9], 4294967264 }
  0x4d   :  { %2217 = dma.done.wait [#allocation12], 256  }
  0x4e   :  { %2218 = vsyncadd [#allocation12], 4294967040  ;;  %v2231_v0 = vmov 0.0   ;;  %vm2232_vm0 = vmmov 0   ;;  %v2347_v1 = vld [vmem:[%s2629_s0] sm:$0xff]  ;;  %v128_v2 = vld [vmem:[%s2634_s5 + $0x10] sm:$0xff]  ;;  %v338_v28 = vlaneseq }
  0x4f   :  { %1862 = vmatprep.subr.mxu0 %v2231_v0  ;;  %1868 = vmatprep.mubr.msk.f32.mxu0 %vm2232_vm0, %v2231_v0  ;;  %v127_v3 = vld [vmem:[%s2634_s5 + $0x8] sm:$0xff]  ;;  %s2233_s24 = smov 126   ;;  %v126_v4 = vld [vmem:[%s2634_s5] sm:$0xff]  ;;  %s2234_s0 = smov 102   ;;  %vm139_vm1 = vcmask 195584   ;;  %vm229_vm2 = vcmask 261120  }
  0x50   :  { %1871 = vmatprep.subr.mxu1 %v2231_v0  ;;  %1879 = vmatprep.mubr.msk.f32.mxu1 %vm2232_vm0, %v2231_v0  ;;  %v329_v5 = vld [vmem:[#allocation2 + $0xc8] sm:$0xff]  ;;  %v328_v6 = vld [vmem:[#allocation2 + $0xc0] sm:$0xff]  ;;  %v221_v23 = vld [vmem:[%s2636_s7 + $0x18] sm:$0xff]  ;;  %v2388_v29 = vshrl.u32 %v338_v28, 7  ;;  %s2236_s27 = smov 68   ;;  %vm1504_vm3 = vcmask 1041408  }
  0x51   :  { %137 = vrot.lane.b32.xlu0 %v2347_v1, %s2233_s24  ;;  %1863 = vmatpush3.msra.mxu0 %v128_v2  ;;  %v321_v8 = vld [vmem:[#allocation2 + $0x88] sm:$0xff]  ;;  %v320_v9 = vld [vmem:[#allocation2 + $0x80] sm:$0xff]  ;;  %v220_v24 = vld [vmem:[%s2636_s7 + $0x10] sm:$0xff]  ;;  %vm1500_vm4 = vcmask 15360   ;;  %vm1677_vm5 = vcmask 130048   ;;  %s2238_s8 = smov [#allocation13]  }
  0x52   :  { %1864 = vmatprep.subr.mxu0 %v2231_v0  ;;  %v313_v10 = vld [vmem:[#allocation2 + $0x48] sm:$0xff]  ;;  %v312_v11 = vld [vmem:[#allocation2 + $0x40] sm:$0xff]  ;;  %1872 = vmatpush3.msra.mxu1 %v221_v23  ;;  %v331_v27 = vld [vmem:[#allocation2 + $0xd8] sm:$0xff]  ;;  %v340_v33 = vsub.s32 0, %v2388_v29  ;;  %s1759_s13 = sshll.u32 %s2238_s8, 4  ;;  %s1760_s13 = int_to_ptr.vmem [resolvable:$true] %s1759_s13 }
  0x53   :  { %1865 = vmatpush3.msra.mxu0 %v127_v3  ;;  %v305_v12 = vld [vmem:[#allocation2 + $0x8] sm:$0xff]  ;;  %v304_v13 = vld [vmem:[#allocation2] sm:$0xff]  ;;  %1873 = vmatprep.subr.mxu1 %v2231_v0  ;;  %v330_v45 = vld [vmem:[#allocation2 + $0xd0] sm:$0xff]  ;;  %p2196_p3 = scmp.lt.s32.totalorder %s1760_s13, %s1760_s13 }
  0x54   :  { %1866 = vmatprep.subr.mxu0 %v2231_v0  ;;  %v333_v15 = vld [vmem:[#allocation2 + $0xe8] sm:$0xff]  ;;  %v332_v16 = vld [vmem:[#allocation2 + $0xe0] sm:$0xff]  ;;  %1874 = vmatpush3.msra.mxu1 %v220_v24  ;;  %v323_v47 = vld [vmem:[#allocation2 + $0x98] sm:$0xff] }
  0x55   :  { %378 = vrot.lane.b32.xlu0 %v2347_v1, %s2234_s0  ;;  %1867 = vmatpush3.msra.mxu0 %v126_v4  ;;  %v325_v17 = vld [vmem:[#allocation2 + $0xa8] sm:$0xff]  ;;  %v324_v18 = vld [vmem:[#allocation2 + $0xa0] sm:$0xff]  ;;  %v322_v48 = vld [vmem:[#allocation2 + $0x90] sm:$0xff] }
  0x56   :  { %406 = vmatprep.subr.mxu0 %v329_v5  ;;  %v317_v19 = vld [vmem:[#allocation2 + $0x68] sm:$0xff]  ;;  %v316_v20 = vld [vmem:[#allocation2 + $0x60] sm:$0xff]  ;;  %1875 = vmatprep.subr.mxu1 %v2231_v0  ;;  %v315_v49 = vld [vmem:[#allocation2 + $0x58] sm:$0xff] }
  0x57   :  { %v309_v21 = vld [vmem:[#allocation2 + $0x28] sm:$0xff]  ;;  %v308_v22 = vld [vmem:[#allocation2 + $0x20] sm:$0xff]  ;;  %v314_v50 = vld [vmem:[#allocation2 + $0x50] sm:$0xff] }
  0x58   :  { %v219_v25 = vld [vmem:[%s2636_s7 + $0x8] sm:$0xff]  ;;  %v218_v26 = vld [vmem:[%s2636_s7] sm:$0xff]  ;;  %v307_v51 = vld [vmem:[#allocation2 + $0x18] sm:$0xff] }
  0x59   :  { %1876 = vmatpush3.msra.mxu1 %v219_v25  ;;  %v1771_v30 = vld [vmem:[#allocation8] ss:$0 sm:$0xff]  ;;  %v2391_v35 = vld [vmem:[#allocation5] sm:$0xff]  ;;  %v306_v52 = vld [vmem:[#allocation2 + $0x10] sm:$0xff] }
  0x5a   :  { %1877 = vmatprep.subr.mxu1 %v2231_v0  ;;  %v341_v37 = vrot.slane %v2391_v35, %v340_v33  ;;  %v335_v53 = vld [vmem:[#allocation2 + $0xf8] sm:$0xff]  ;;  %v1780_v54 = vld [vmem:[#allocation7] ss:$0 sm:$0xff]  ;;  %v334_v55 = vld [vmem:[#allocation2 + $0xf0] sm:$0xff] }
  0x5b   :  { %1878 = vmatpush3.msra.mxu1 %v218_v26  ;;  %v327_v57 = vld [vmem:[#allocation2 + $0xb8] sm:$0xff]  ;;  %v326_v59 = vld [vmem:[#allocation2 + $0xb0] sm:$0xff] }
  0x5c   :  { %477 = vmatprep.subr.mxu1 %v331_v27  ;;  %v319_v60 = vld [vmem:[#allocation2 + $0x78] sm:$0xff]  ;;  %v318_v61 = vld [vmem:[#allocation2 + $0x70] sm:$0xff] }
  0x5d   :  { %v311_v62 = vld [vmem:[#allocation2 + $0x38] sm:$0xff]  ;;  %v310_v63 = vld [vmem:[#allocation2 + $0x30] sm:$0xff] }
  0x5e   :  { %v2408_v4 = vld [vmem:[%s2632_s3 + $0x18] sm:$0xff]  ;;  %v2413_v5 = vld [vmem:[%s2632_s3 + $0x10] sm:$0xff] }
  0xc3   :  { %v138_v7 = vpop.permute.xlu0 %137 }
  0xc4   :  { %1869 = vmatmul.mubr.msk.f32.vlgmr.msra.gmra.mxu0 %vm139_vm1, %v138_v7  ;;  %v2430_v7 = vld [vmem:[%s2632_s3] sm:$0xff] }
  0xc5   :  { %407 = vmatpush1.msra.mxu0 %v328_v6  ;;  %446 = vmatprep.mubr.f32.mxu0 %v2231_v0  ;;  %v2421_v6 = vld [vmem:[%s2632_s3 + $0x8] sm:$0xff]  ;;  %s2235_s3 = smov 96  }
  0xc6   :  { %408 = vmatprep.subr.mxu0 %v321_v8 }
  0xc7   :  { %409 = vmatpush1.msra.mxu0 %v320_v9  ;;  %v2363_v14 = vpop.permute.xlu0 %378 }
  0xc8   :  { %410 = vmatprep.subr.mxu0 %v313_v10 }
  0xc9   :  { %411 = vmatpush1.msra.mxu0 %v312_v11 }
  0xca   :  { %412 = vmatprep.subr.mxu0 %v305_v12 }
  0xcb   :  { %413 = vmatpush1.msra.mxu0 %v304_v13 }
  0xcc   :  { %1776 = vmatmul.mubr.msk.f32.vlgmr.msra.gmra.mxu0 %vm229_vm2, %v2363_v14  ;;  %548 = vmatprep.subr.mxu0 %v333_v15 }
  0xcd   :  { %549 = vmatpush1.msra.mxu0 %v332_v16  ;;  %588 = vmatprep.mubr.f32.mxu0 %v2231_v0 }
  0xce   :  { %550 = vmatprep.subr.mxu0 %v325_v17 }
  0xcf   :  { %551 = vmatpush1.msra.mxu0 %v324_v18 }
  0xd0   :  { %552 = vmatprep.subr.mxu0 %v317_v19 }
  0xd1   :  { %553 = vmatpush1.msra.mxu0 %v316_v20 }
  0xd2   :  { %554 = vmatprep.subr.mxu0 %v309_v21 }
  0xd3   :  { %555 = vmatpush1.msra.mxu0 %v308_v22  ;;  %v344_v22 = vsub.s32 1, %v2388_v29 }
  0xd4   :  { %1778 = vmatmul.mubr.msk.f32.vlgmr.msra.gmra.mxu0 %vm229_vm2, %v2363_v14  ;;  %1882 = vmatprep.subr.mxu0 %v2231_v0 }
  0xd5   :  { %1890 = vmatprep.mubr.msk.f32.mxu0 %vm2232_vm0, %v2231_v0  ;;  %1883 = vmatpush3.msra.mxu0 %v2408_v4  ;;  %v345_v23 = vrot.slane %v2391_v35, %v344_v22 }
  0xd6   :  { %1884 = vmatprep.subr.mxu0 %v2231_v0 }
  0xd7   :  { %1885 = vmatpush3.msra.mxu0 %v2413_v5 }
  0xd8   :  { %1886 = vmatprep.subr.mxu0 %v2231_v0 }
  0xd9   :  { %1887 = vmatpush3.msra.mxu0 %v2421_v6 }
  0xda   :  { %1888 = vmatprep.subr.mxu0 %v2231_v0 }
  0xdb   :  { %1889 = vmatpush3.msra.mxu0 %v2430_v7 }
  0xdc   :  { %1904 = vmatprep.subr.mxu0 %v2231_v0 }
 0x184   :  { %v208_v31 = vpop.f32.mrf.mxu0 }
 0x185   :  { %v209_v32 = vadd.f32 %v1771_v30, %v208_v31 }
 0x186   :  { %v1870_v34 = vpop.f32.mrf.mxu0 }
 0x187   :  { %v1773_v36 = vmul.f32 -1.442695, %v209_v32 }
 0x189   :  { %2011 = vpow2.f32 %v1773_v36 }
 0x18c   :  { %v448_v38 = vpop.f32.mrf.mxu0 }
 0x18d   :  { %v449_v39 = vadd.f32 %v448_v38, %v341_v37 }
 0x18e   :  { %v450_v15 = vpop.f32.mrf.mxu0 }
 0x18f   :  { %v1781_v40 = vmul.f32 -1.442695, %v449_v39  ;;  %v451_v24 = vadd.f32 %v450_v15, %v345_v23  ;;  %v352_v15 = vsub.s32 3, %v2388_v29 }
 0x191   :  { %2013 = vpow2.f32 %v1781_v40 }
 0x194   :  { %v2457_v16 = vpop.f32.mrf.mxu0 }
 0x196   :  { %v2012_v41 = vpop.eup %2011  ;;  %v2459_v17 = vpop.f32.mrf.mxu0 }
 0x197   :  { %v215_v42 = vadd.f32 1.0, %v2012_v41 }
 0x199   :  { %2015 = vrcp.f32 %v215_v42 }
 0x19e   :  { %v2014_v43 = vpop.eup %2013 }
 0x19f   :  { %v680_v44 = vadd.f32 1.0, %v2014_v43 }
 0x1a1   :  { %2017 = vrcp.f32 %v680_v44 }
 0x1a6   :  { %v2016_v46 = vpop.eup %2015 }
 0x1a7   :  { %1880 = vmatmul.mubr.msk.f32.vlgmr.msra.gmra.mxu1 %vm229_vm2, %v2016_v46 }
 0x1a8   :  { %478 = vmatpush1.msra.mxu1 %v330_v45  ;;  %517 = vmatprep.mubr.f32.mxu1 %v2231_v0 }
 0x1a9   :  { %479 = vmatprep.subr.mxu1 %v323_v47 }
 0x1aa   :  { %480 = vmatpush1.msra.mxu1 %v322_v48 }
 0x1ab   :  { %481 = vmatprep.subr.mxu1 %v315_v49 }
 0x1ac   :  { %482 = vmatpush1.msra.mxu1 %v314_v50  ;;  %v348_v50 = vsub.s32 2, %v2388_v29 }
 0x1ad   :  { %483 = vmatprep.subr.mxu1 %v307_v51 }
 0x1ae   :  { %v2018_v56 = vpop.eup %2017  ;;  %484 = vmatpush1.msra.mxu1 %v306_v52  ;;  %v349_v51 = vrot.slane %v2391_v35, %v348_v50 }
 0x1af   :  { %1777 = vmatmul.mubr.msk.f32.vlgmr.msra.gmra.mxu1 %vm229_vm2, %v2363_v14  ;;  %619 = vmatprep.subr.mxu1 %v335_v53  ;;  %v683_v58 = vmul.f32 %v2018_v56, %v1780_v54  ;;  %v690_v11 = vsub.f32 1.0, %v2018_v56 }
 0x1b0   :  { %620 = vmatpush1.msra.mxu1 %v334_v55  ;;  %659 = vmatprep.mubr.f32.mxu1 %v2231_v0 }
 0x1b1   :  { %621 = vmatprep.subr.mxu1 %v327_v57  ;;  %685 = vrot.lane.b32.xlu1 %v683_v58, %s2225_s17 }
 0x1b2   :  { %622 = vmatpush1.msra.mxu1 %v326_v59 }
 0x1b3   :  { %623 = vmatprep.subr.mxu1 %v319_v60 }
 0x1b4   :  { %624 = vmatpush1.msra.mxu1 %v318_v61 }
 0x1b5   :  { %625 = vmatprep.subr.mxu1 %v311_v62 }
 0x1b6   :  { %626 = vmatpush1.msra.mxu1 %v310_v63 }
 0x1b7   :  { %1779 = vmatmul.mubr.msk.f32.vlgmr.msra.gmra.mxu1 %vm229_vm2, %v2363_v14  ;;  %1893 = vmatprep.subr.mxu1 %v2231_v0 }
 0x1b8   :  { %1901 = vmatprep.mubr.msk.f32.mxu1 %vm2232_vm0, %v2231_v0  ;;  %1894 = vmatpush3.msra.mxu1 %v2408_v4 }
 0x1b9   :  { %1895 = vmatprep.subr.mxu1 %v2231_v0 }
 0x1ba   :  { %1896 = vmatpush3.msra.mxu1 %v2413_v5 }
 0x1bb   :  { %1897 = vmatprep.subr.mxu1 %v2231_v0 }
 0x1bc   :  { %1898 = vmatpush3.msra.mxu1 %v2421_v6 }
 0x1bd   :  { %1899 = vmatprep.subr.mxu1 %v2231_v0 }
 0x1be   :  { %1900 = vmatpush3.msra.mxu1 %v2430_v7 }
 0x1bf   :  { %1915 = vmatprep.subr.mxu1 %v2231_v0 }
 0x223   :  { %v686_v2 = vpop.permute.xlu1 %685 }
 0x224   :  { %v688_v3 = vadd.f32 %v686_v2, %v449_v39 }
 0x226   :  { %2019 = vtanh.f32 %v688_v3 }
 0x233   :  { %v2020_v8 = vpop.eup %2019 }
 0x234   :  { %692 = vrot.lane.b32.xlu1 %v2020_v8, %s2235_s3 }
 0x238   :  { %778 = vrot.lane.b32.xlu1 %v1780_v54, %s2225_s17 }
 0x267   :  { %v2443_v9 = vpop.f32.mrf.mxu1 }
 0x269   :  { %v1881_v10 = vpop.f32.mrf.mxu1 }
 0x26f   :  { %v519_v43 = vpop.f32.mrf.mxu1 }
 0x270   :  { %v520_v52 = vadd.f32 %v519_v43, %v349_v51 }
 0x271   :  { %v521_v44 = vpop.f32.mrf.mxu1 }
 0x277   :  { %v2481_v45 = vpop.f32.mrf.mxu1 }
 0x279   :  { %v2483_v46 = vpop.f32.mrf.mxu1 }
 0x2a6   :  { %v693_v12 = vpop.permute.xlu1 %692 }
 0x2a7   :  { %v695_v13 = vmul.f32 %v693_v12, %v690_v11 }
 0x2a9   :  { %697 = vrot.lane.b32.xlu0 %v695_v13, %s2235_s3 }
 0x2aa   :  { %v2461_v18 = vpop.permute.xlu1 %778 }
 0x31b   :  { %v698_v14 = vpop.permute.xlu0 %697 }
 0x31c   :  { %1891 = vmatmul.mubr.msk.f32.vlgmr.msra.gmra.mxu0 %vm229_vm2, %v698_v14 }
 0x31d   :  { %1905 = vmatpush3.msra.mxu0 %v2408_v4  ;;  %1912 = vmatprep.mubr.msk.f32.mxu0 %vm2232_vm0, %v2231_v0 }
 0x31e   :  { %1906 = vmatprep.subr.mxu0 %v2231_v0 }
 0x31f   :  { %1907 = vmatpush3.msra.mxu0 %v2413_v5 }
 0x320   :  { %1908 = vmatprep.subr.mxu0 %v2231_v0 }
 0x321   :  { %1909 = vmatpush3.msra.mxu0 %v2421_v6 }
 0x322   :  { %1910 = vmatprep.subr.mxu0 %v2231_v0 }
 0x323   :  { %1911 = vmatpush3.msra.mxu0 %v2430_v7 }
 0x324   :  { %1926 = vmatprep.subr.mxu0 %v2231_v0 }
 0x3dc   :  { %v767_v19 = vpop.f32.mrf.mxu0 }
 0x3dd   :  { %v781_v20 = vadd.f32 %v2461_v18, %v767_v19  ;;  %v771_v25 = vadd.f32 %v767_v19, %v451_v24  ;;  %v353_v19 = vrot.slane %v2391_v35, %v352_v15 }
 0x3de   :  { %v1892_v21 = vpop.f32.mrf.mxu0 }
 0x3df   :  { %783 = vrot.lane.b32.xlu0 %v781_v20, %s2225_s17  ;;  %v1783_v26 = vmul.f32 -1.442695, %v771_v25  ;;  %v522_v20 = vadd.f32 %v521_v44, %v353_v19 }
 0x3e1   :  { %2021 = vpow2.f32 %v1783_v26 }
 0x3ee   :  { %v2022_v27 = vpop.eup %2021 }
 0x3ef   :  { %v775_v28 = vadd.f32 1.0, %v2022_v27 }
 0x3f1   :  { %2023 = vrcp.f32 %v775_v28 }
 0x3fe   :  { %v2024_v30 = vpop.eup %2023 }
 0x3ff   :  { %v793_v37 = vsub.f32 1.0, %v2024_v30  ;;  %v799_v39 = vmul.f32 %v2024_v30, %v695_v13 }
 0x451   :  { %v784_v31 = vpop.permute.xlu0 %783 }
 0x452   :  { %v786_v32 = vmul.f32 %v2024_v30, %v784_v31 }
 0x454   :  { %788 = vrot.lane.b32.xlu1 %v786_v32, %s2225_s17 }
 0x4c6   :  { %v789_v33 = vpop.permute.xlu1 %788 }
 0x4c7   :  { %v791_v34 = vadd.f32 %v789_v33, %v451_v24 }
 0x4c9   :  { %2025 = vtanh.f32 %v791_v34 }
 0x4d6   :  { %v2026_v36 = vpop.eup %2025 }
 0x4d7   :  { %795 = vrot.lane.b32.xlu0 %v2026_v36, %s2235_s3 }
 0x549   :  { %v796_v38 = vpop.permute.xlu0 %795 }
 0x54a   :  { %v798_v40 = vmul.f32 %v796_v38, %v793_v37 }
 0x54c   :  { %v800_v41 = vadd.f32 %v799_v39, %v798_v40 }
 0x54e   :  { %802 = vrot.lane.b32.xlu1 %v800_v41, %s2235_s3 }
 0x5c0   :  { %v803_v42 = vpop.permute.xlu1 %802 }
 0x5c1   :  { %1902 = vmatmul.mubr.msk.f32.vlgmr.msra.gmra.mxu1 %vm229_vm2, %v803_v42  ;;  %v356_v42 = vsub.s32 4, %v2388_v29 }
 0x5c2   :  { %1916 = vmatpush3.msra.mxu1 %v2408_v4  ;;  %1923 = vmatprep.mubr.msk.f32.mxu1 %vm2232_vm0, %v2231_v0 }
 0x5c3   :  { %1917 = vmatprep.subr.mxu1 %v2231_v0  ;;  %v357_v43 = vrot.slane %v2391_v35, %v356_v42 }
 0x5c4   :  { %1918 = vmatpush3.msra.mxu1 %v2413_v5 }
 0x5c5   :  { %1919 = vmatprep.subr.mxu1 %v2231_v0  ;;  %v591_v44 = vadd.f32 %v2457_v16, %v357_v43 }
 0x5c6   :  { %1920 = vmatpush3.msra.mxu1 %v2421_v6 }
 0x5c7   :  { %1921 = vmatprep.subr.mxu1 %v2231_v0 }
 0x5c8   :  { %1922 = vmatpush3.msra.mxu1 %v2430_v7 }
 0x5c9   :  { %1937 = vmatprep.subr.mxu1 %v2231_v0 }
 0x681   :  { %v872_v47 = vpop.f32.mrf.mxu1 }
 0x682   :  { %v883_v48 = vadd.f32 %v872_v47, %v2461_v18  ;;  %v876_v53 = vadd.f32 %v872_v47, %v520_v52 }
 0x683   :  { %v1903_v49 = vpop.f32.mrf.mxu1 }
 0x684   :  { %885 = vrot.lane.b32.xlu0 %v883_v48, %s2225_s17  ;;  %v1785_v54 = vmul.f32 -1.442695, %v876_v53 }
 0x686   :  { %2027 = vpow2.f32 %v1785_v54 }
 0x693   :  { %v2028_v55 = vpop.eup %2027 }
 0x694   :  { %v880_v56 = vadd.f32 1.0, %v2028_v55 }
 0x696   :  { %2029 = vrcp.f32 %v880_v56 }
 0x6a3   :  { %v2030_v57 = vpop.eup %2029 }
 0x6a4   :  { %v895_v63 = vsub.f32 1.0, %v2030_v57  ;;  %v901_v3 = vmul.f32 %v2030_v57, %v800_v41 }
 0x6f6   :  { %v886_v58 = vpop.permute.xlu0 %885 }
 0x6f7   :  { %v888_v59 = vmul.f32 %v2030_v57, %v886_v58 }
 0x6f9   :  { %890 = vrot.lane.b32.xlu1 %v888_v59, %s2225_s17 }
 0x76b   :  { %v891_v60 = vpop.permute.xlu1 %890 }
 0x76c   :  { %v893_v61 = vadd.f32 %v891_v60, %v520_v52 }
 0x76e   :  { %2031 = vtanh.f32 %v893_v61 }
 0x77b   :  { %v2032_v62 = vpop.eup %2031 }
 0x77c   :  { %897 = vrot.lane.b32.xlu0 %v2032_v62, %s2235_s3 }
 0x7ee   :  { %v898_v2 = vpop.permute.xlu0 %897 }
 0x7ef   :  { %v900_v8 = vmul.f32 %v898_v2, %v895_v63  ;;  %v360_v2 = vsub.s32 5, %v2388_v29 }
 0x7f1   :  { %v902_v10 = vadd.f32 %v901_v3, %v900_v8 }
 0x7f3   :  { %904 = vrot.lane.b32.xlu1 %v902_v10, %s2235_s3 }
 0x865   :  { %v905_v11 = vpop.permute.xlu1 %904 }
 0x866   :  { %1913 = vmatmul.mubr.msk.f32.vlgmr.msra.gmra.mxu0 %vm229_vm2, %v905_v11 }
 0x867   :  { %1927 = vmatpush3.msra.mxu0 %v2408_v4  ;;  %1934 = vmatprep.mubr.msk.f32.mxu0 %vm2232_vm0, %v2231_v0 }
 0x868   :  { %1928 = vmatprep.subr.mxu0 %v2231_v0 }
 0x869   :  { %1929 = vmatpush3.msra.mxu0 %v2413_v5 }
 0x86a   :  { %1930 = vmatprep.subr.mxu0 %v2231_v0 }
 0x86b   :  { %1931 = vmatpush3.msra.mxu0 %v2421_v6 }
 0x86c   :  { %1932 = vmatprep.subr.mxu0 %v2231_v0 }
 0x86d   :  { %1933 = vmatpush3.msra.mxu0 %v2430_v7 }
 0x86e   :  { %1948 = vmatprep.subr.mxu0 %v2231_v0 }
 0x926   :  { %v974_v12 = vpop.f32.mrf.mxu0 }
 0x927   :  { %v985_v13 = vadd.f32 %v974_v12, %v2461_v18  ;;  %v978_v21 = vadd.f32 %v974_v12, %v522_v20 }
 0x928   :  { %v1914_v14 = vpop.f32.mrf.mxu0 }
 0x929   :  { %987 = vrot.lane.b32.xlu0 %v985_v13, %s2225_s17  ;;  %v1787_v22 = vmul.f32 -1.442695, %v978_v21 }
 0x92b   :  { %2033 = vpow2.f32 %v1787_v22 }
 0x938   :  { %v2034_v23 = vpop.eup %2033 }
 0x939   :  { %v982_v24 = vadd.f32 1.0, %v2034_v23 }
 0x93b   :  { %2035 = vrcp.f32 %v982_v24 }
 0x948   :  { %v2036_v25 = vpop.eup %2035 }
 0x949   :  { %v997_v32 = vsub.f32 1.0, %v2036_v25  ;;  %v1003_v34 = vmul.f32 %v2036_v25, %v902_v10 }
 0x99b   :  { %v988_v26 = vpop.permute.xlu0 %987 }
 0x99c   :  { %v990_v27 = vmul.f32 %v2036_v25, %v988_v26 }
 0x99e   :  { %992 = vrot.lane.b32.xlu1 %v990_v27, %s2225_s17 }
 0xa10   :  { %v993_v28 = vpop.permute.xlu1 %992 }
 0xa11   :  { %v995_v30 = vadd.f32 %v993_v28, %v522_v20  ;;  %v364_v28 = vsub.s32 6, %v2388_v29 }
 0xa13   :  { %2037 = vtanh.f32 %v995_v30  ;;  %v365_v30 = vrot.slane %v2391_v35, %v364_v28  ;;  %v1669_v28 = vld [vmem:[#allocation11 + $0x8] sm:$0xff] }
 0xa20   :  { %v2038_v31 = vpop.eup %2037 }
 0xa21   :  { %999 = vrot.lane.b32.xlu0 %v2038_v31, %s2235_s3  ;;  %v662_v31 = vadd.f32 %v2481_v45, %v365_v30  ;;  %v1668_v30 = vld [vmem:[#allocation11] sm:$0xff] }
 0xa93   :  { %v1000_v33 = vpop.permute.xlu0 %999 }
 0xa94   :  { %v1002_v36 = vmul.f32 %v1000_v33, %v997_v32 }
 0xa96   :  { %v1004_v37 = vadd.f32 %v1003_v34, %v1002_v36 }
 0xa98   :  { %1006 = vrot.lane.b32.xlu1 %v1004_v37, %s2235_s3 }
 0xb0a   :  { %v1007_v38 = vpop.permute.xlu1 %1006 }
 0xb0b   :  { %1924 = vmatmul.mubr.msk.f32.vlgmr.msra.gmra.mxu1 %vm229_vm2, %v1007_v38 }
 0xb0c   :  { %1938 = vmatpush3.msra.mxu1 %v2408_v4  ;;  %1945 = vmatprep.mubr.msk.f32.mxu1 %vm2232_vm0, %v2231_v0 }
 0xb0d   :  { %1939 = vmatprep.subr.mxu1 %v2231_v0 }
 0xb0e   :  { %1940 = vmatpush3.msra.mxu1 %v2413_v5 }
 0xb0f   :  { %1941 = vmatprep.subr.mxu1 %v2231_v0 }
 0xb10   :  { %1942 = vmatpush3.msra.mxu1 %v2421_v6 }
 0xb11   :  { %1943 = vmatprep.subr.mxu1 %v2231_v0 }
 0xb12   :  { %1944 = vmatpush3.msra.mxu1 %v2430_v7 }
 0xb13   :  { %1959 = vmatprep.subr.mxu1 %v2231_v0 }
 0xbcb   :  { %v1076_v39 = vpop.f32.mrf.mxu1 }
 0xbcc   :  { %v1087_v40 = vadd.f32 %v1076_v39, %v2461_v18  ;;  %v1080_v47 = vadd.f32 %v1076_v39, %v591_v44 }
 0xbcd   :  { %v1925_v41 = vpop.f32.mrf.mxu1 }
 0xbce   :  { %1089 = vrot.lane.b32.xlu0 %v1087_v40, %s2225_s17  ;;  %v1789_v48 = vmul.f32 -1.442695, %v1080_v47 }
 0xbd0   :  { %2039 = vpow2.f32 %v1789_v48 }
 0xbdd   :  { %v2040_v49 = vpop.eup %2039 }
 0xbde   :  { %v1084_v50 = vadd.f32 1.0, %v2040_v49 }
 0xbe0   :  { %2041 = vrcp.f32 %v1084_v50  ;;  %v1426_v50 = vld [vmem:[%s2639_s10 + $0x18] sm:$0xff] }
 0xbed   :  { %v2042_v51 = vpop.eup %2041 }
 0xbee   :  { %v1099_v57 = vsub.f32 1.0, %v2042_v51  ;;  %v1105_v16 = vmul.f32 %v2042_v51, %v1004_v37 }
 0xc40   :  { %v1090_v52 = vpop.permute.xlu0 %1089 }
 0xc41   :  { %v1092_v53 = vmul.f32 %v2042_v51, %v1090_v52 }
 0xc43   :  { %1094 = vrot.lane.b32.xlu1 %v1092_v53, %s2225_s17 }
 0xcb5   :  { %v1095_v54 = vpop.permute.xlu1 %1094 }
 0xcb6   :  { %v1097_v55 = vadd.f32 %v1095_v54, %v591_v44  ;;  %v368_v54 = vsub.s32 7, %v2388_v29  ;;  %v1424_v29 = vld [vmem:[%s2639_s10 + $0x8] sm:$0xff] }
 0xcb8   :  { %2043 = vtanh.f32 %v1097_v55  ;;  %v369_v55 = vrot.slane %v2391_v35, %v368_v54 }
 0xcc5   :  { %v2044_v56 = vpop.eup %2043 }
 0xcc6   :  { %1101 = vrot.lane.b32.xlu0 %v2044_v56, %s2235_s3  ;;  %v664_v56 = vadd.f32 %v2483_v46, %v369_v55 }
 0xd38   :  { %v1102_v58 = vpop.permute.xlu0 %1101 }
 0xd39   :  { %v1104_v59 = vmul.f32 %v1102_v58, %v1099_v57 }
 0xd3b   :  { %v1106_v60 = vadd.f32 %v1105_v16, %v1104_v59 }
 0xd3d   :  { %1108 = vrot.lane.b32.xlu1 %v1106_v60, %s2235_s3 }
 0xdaf   :  { %v1109_v61 = vpop.permute.xlu1 %1108 }
 0xdb0   :  { %1935 = vmatmul.mubr.msk.f32.vlgmr.msra.gmra.mxu0 %vm229_vm2, %v1109_v61 }
 0xdb1   :  { %1949 = vmatpush3.msra.mxu0 %v2408_v4  ;;  %1956 = vmatprep.mubr.msk.f32.mxu0 %vm2232_vm0, %v2231_v0 }
 0xdb2   :  { %1950 = vmatprep.subr.mxu0 %v2231_v0 }
 0xdb3   :  { %1951 = vmatpush3.msra.mxu0 %v2413_v5  ;;  %v361_v5 = vrot.slane %v2391_v35, %v360_v2  ;;  %v1423_v35 = vld [vmem:[%s2639_s10] sm:$0xff] }
 0xdb4   :  { %1952 = vmatprep.subr.mxu0 %v2231_v0 }
 0xdb5   :  { %1953 = vmatpush3.msra.mxu0 %v2421_v6  ;;  %v593_v3 = vadd.f32 %v2459_v17, %v361_v5 }
 0xdb6   :  { %1954 = vmatprep.subr.mxu0 %v2231_v0 }
 0xdb7   :  { %1955 = vmatpush3.msra.mxu0 %v2430_v7 }
 0xdb8   :  { %1970 = vmatprep.subr.mxu0 %v2231_v0 }
 0xe70   :  { %v1178_v62 = vpop.f32.mrf.mxu0 }
 0xe71   :  { %v1189_v4 = vadd.f32 %v1178_v62, %v2461_v18  ;;  %v1182_v8 = vadd.f32 %v1178_v62, %v593_v3  ;;  %v1774_v62 = vld [vmem:[#allocation10] ss:$0 sm:$0xff] }
 0xe72   :  { %v1936_v63 = vpop.f32.mrf.mxu0 }
 0xe73   :  { %1191 = vrot.lane.b32.xlu0 %v1189_v4, %s2225_s17  ;;  %v1791_v6 = vmul.f32 -1.442695, %v1182_v8  ;;  %v300_v4 = vadd.f32 %v1774_v62, %v2443_v9 }
 0xe75   :  { %2045 = vpow2.f32 %v1791_v6  ;;  %v1418_v6 = vld [vmem:[%s2638_s9] sm:$0x3] }
 0xe82   :  { %v2046_v10 = vpop.eup %2045 }
 0xe83   :  { %v1186_v11 = vadd.f32 1.0, %v2046_v10  ;;  %v1582_v10 = vld [vmem:[%s2640_s11 + $0x18] sm:$0xff] }
 0xe85   :  { %2047 = vrcp.f32 %v1186_v11  ;;  %v1581_v11 = vld [vmem:[%s2640_s11 + $0x10] sm:$0xff] }
 0xe92   :  { %v2048_v7 = vpop.eup %2047 }
 0xe93   :  { %v1201_v20 = vsub.f32 1.0, %v2048_v7  ;;  %v1207_v17 = vmul.f32 %v2048_v7, %v1106_v60  ;;  %v1425_v60 = vld [vmem:[%s2639_s10 + $0x10] sm:$0xff] }
 0xee5   :  { %v1192_v12 = vpop.permute.xlu0 %1191 }
 0xee6   :  { %v1194_v13 = vmul.f32 %v2048_v7, %v1192_v12  ;;  %v1580_v7 = vld [vmem:[%s2640_s11 + $0x8] sm:$0xff] }
 0xee8   :  { %1196 = vrot.lane.b32.xlu1 %v1194_v13, %s2225_s17 }
 0xf5a   :  { %v1197_v14 = vpop.permute.xlu1 %1196 }
 0xf5b   :  { %v1199_v15 = vadd.f32 %v1197_v14, %v593_v3 }
 0xf5d   :  { %2049 = vtanh.f32 %v1199_v15 }
 0xf6a   :  { %v2050_v19 = vpop.eup %2049 }
 0xf6b   :  { %1203 = vrot.lane.b32.xlu0 %v2050_v19, %s2235_s3 }
 0xfdd   :  { %v1204_v21 = vpop.permute.xlu0 %1203 }
 0xfde   :  { %v1206_v22 = vmul.f32 %v1204_v21, %v1201_v20 }
 0xfe0   :  { %v1208_v23 = vadd.f32 %v1207_v17, %v1206_v22  ;;  %v1579_v17 = vld [vmem:[%s2640_s11] sm:$0xff] }
 0xfe2   :  { %1210 = vrot.lane.b32.xlu1 %v1208_v23, %s2235_s3 }
0x1054   :  { %v1211_v24 = vpop.permute.xlu1 %1210 }
0x1055   :  { %1946 = vmatmul.mubr.msk.f32.vlgmr.msra.gmra.mxu1 %vm229_vm2, %v1211_v24 }
0x1056   :  { %1967 = vmatprep.mubr.msk.f32.mxu1 %vm2232_vm0, %v2231_v0  ;;  %1960 = vmatpush3.msra.mxu1 %v1426_v50 }
0x1057   :  { %1961 = vmatprep.subr.mxu1 %v2231_v0 }
0x1058   :  { %1962 = vmatpush3.msra.mxu1 %v1425_v60 }
0x1059   :  { %1963 = vmatprep.subr.mxu1 %v2231_v0 }
0x105a   :  { %1964 = vmatpush3.msra.mxu1 %v1424_v29 }
0x105b   :  { %1965 = vmatprep.subr.mxu1 %v2231_v0 }
0x105c   :  { %1966 = vmatpush3.msra.mxu1 %v1423_v35 }
0x105d   :  { %1975 = vmatprep.subr.mxu1 %v2231_v0 }
0x1115   :  { %v1280_v25 = vpop.f32.mrf.mxu1 }
0x1116   :  { %v1291_v26 = vadd.f32 %v1280_v25, %v2461_v18  ;;  %v1284_v32 = vadd.f32 %v1280_v25, %v662_v31 }
0x1117   :  { %v1947_v27 = vpop.f32.mrf.mxu1 }
0x1118   :  { %1293 = vrot.lane.b32.xlu0 %v1291_v26, %s2225_s17  ;;  %v1793_v33 = vmul.f32 -1.442695, %v1284_v32 }
0x111a   :  { %2051 = vpow2.f32 %v1793_v33  ;;  %v1800_v33 = vld [vmem:[%s2641_s12] ss:$0 sm:$0xff]  ;;  %s2191_s12 = scalar_lea.vmem %s1760_s13, 128 }
0x111b   :  { %p2192_p2 = scmp.ne.s32.totalorder %s1760_s13, %s2191_s12  ;;  %p2197_p4 = scmp.lt.s32.totalorder %s2191_s12, %s2191_s12 }
0x111d   :  { %p2198_p5 = por %p2197_p4, %p2196_p3 }
0x111f   :  { %p2199_p6 = pnand %p2198_p5, %p2192_p2 }
0x1127   :  { %v2052_v34 = vpop.eup %2051 }
0x1128   :  { %v1288_v36 = vadd.f32 1.0, %v2052_v34 }
0x112a   :  { %2053 = vrcp.f32 %v1288_v36 }
0x1137   :  { %v2054_v37 = vpop.eup %2053 }
0x1138   :  { %v1303_v43 = vsub.f32 1.0, %v2054_v37  ;;  %v1309_v45 = vmul.f32 %v2054_v37, %v1208_v23 }
0x118a   :  { %v1294_v38 = vpop.permute.xlu0 %1293 }
0x118b   :  { %v1296_v39 = vmul.f32 %v2054_v37, %v1294_v38 }
0x118d   :  { %1298 = vrot.lane.b32.xlu1 %v1296_v39, %s2225_s17  ;;  %v1801_v39 = vld [vmem:[%s2643_s14] ss:$0 sm:$0xff] }
0x11ff   :  { %v1299_v40 = vpop.permute.xlu1 %1298 }
0x1200   :  { %v1301_v41 = vadd.f32 %v1299_v40, %v662_v31 }
0x1202   :  { %2055 = vtanh.f32 %v1301_v41 }
0x120f   :  { %v2056_v42 = vpop.eup %2055 }
0x1210   :  { %1305 = vrot.lane.b32.xlu0 %v2056_v42, %s2235_s3 }
0x1282   :  { %v1306_v44 = vpop.permute.xlu0 %1305 }
0x1283   :  { %v1308_v47 = vmul.f32 %v1306_v44, %v1303_v43 }
0x1285   :  { %v2558_v48 = vadd.f32 %v1309_v45, %v1308_v47 }
0x1287   :  { %1312 = vrot.lane.b32.xlu1 %v2558_v48, %s2235_s3 }
0x12f9   :  { %v1313_v49 = vpop.permute.xlu1 %1312 }
0x12fa   :  { %1957 = vmatmul.mubr.msk.f32.vlgmr.msra.gmra.mxu0 %vm229_vm2, %v1313_v49 }
0x12fb   :  { %1972 = vmatprep.mubr.msk.f32.mxu0 %vm2232_vm0, %v2231_v0  ;;  %1971 = vmatpush3.msk.msra.mxu0 %vm1504_vm3, %v1418_v6 }
0x12fc   :  { %1986 = vmatprep.subr.mxu0 %v2231_v0 }
0x13ba   :  { %v1382_v51 = vpop.f32.mrf.mxu0 }
0x13bb   :  { %v1393_v52 = vadd.f32 %v1382_v51, %v2461_v18  ;;  %v1386_v57 = vadd.f32 %v1382_v51, %v664_v56 }
0x13bc   :  { %v1958_v53 = vpop.f32.mrf.mxu0 }
0x13bd   :  { %1395 = vrot.lane.b32.xlu0 %v1393_v52, %s2225_s17  ;;  %v1795_v58 = vmul.f32 -1.442695, %v1386_v57 }
0x13bf   :  { %2057 = vpow2.f32 %v1795_v58 }
0x13cc   :  { %v2058_v16 = vpop.eup %2057 }
0x13cd   :  { %v1390_v59 = vadd.f32 1.0, %v2058_v16 }
0x13cf   :  { %2059 = vrcp.f32 %v1390_v59 }
0x13d0   :  { %2061 = vtanh.f32 %v300_v4 }
0x13dc   :  { %v2060_v18 = vpop.eup %2059 }
0x13dd   :  { %v2062_v5 = vpop.eup %2061  ;;  %v1405_v12 = vsub.f32 1.0, %v2060_v18  ;;  %v1411_v14 = vmul.f32 %v2060_v18, %v2558_v48 }
0x142f   :  { %v1396_v46 = vpop.permute.xlu0 %1395 }
0x1430   :  { %v1398_v61 = vmul.f32 %v2060_v18, %v1396_v46 }
0x1432   :  { %1400 = vrot.lane.b32.xlu1 %v1398_v61, %s2225_s17  ;;  %s2237_s17 = smov 70  }
0x1436   :  { %1419 = vrot.lane.b32.xlu1 %v2347_v1, %s2236_s27 }
0x14a4   :  { %v1401_v63 = vpop.permute.xlu1 %1400 }
0x14a5   :  { %v1403_v2 = vadd.f32 %v1401_v63, %v664_v56 }
0x14a7   :  { %2063 = vtanh.f32 %v1403_v2 }
0x14a8   :  { %v1420_v3 = vpop.permute.xlu1 %1419 }
0x14a9   :  { %v1422_v8 = vmul.f32 %v2062_v5, %v1420_v3 }
0x14ab   :  { %1968 = vmatmul.mubr.msk.f32.vlgmr.msra.gmra.mxu1 %vm229_vm2, %v1422_v8 }
0x14ac   :  { %1983 = vmatprep.mubr.msk.f32.mxu1 %vm2232_vm0, %v2231_v0  ;;  %1976 = vmatpush3.msra.mxu1 %v1582_v10 }
0x14ad   :  { %1977 = vmatprep.subr.mxu1 %v2231_v0 }
0x14ae   :  { %1978 = vmatpush3.msra.mxu1 %v1581_v11 }
0x14af   :  { %1979 = vmatprep.subr.mxu1 %v2231_v0 }
0x14b0   :  { %1980 = vmatpush3.msra.mxu1 %v1580_v7 }
0x14b1   :  { %1981 = vmatprep.subr.mxu1 %v2231_v0 }
0x14b2   :  { %1982 = vmatpush3.msra.mxu1 %v1579_v17 }
0x14b4   :  { %v2064_v9 = vpop.eup %2063 }
0x14b5   :  { %1407 = vrot.lane.b32.xlu0 %v2064_v9, %s2235_s3 }
0x14b9   :  { %1414 = vrot.lane.b32.xlu0 %v2347_v1, %s2237_s17 }
0x1527   :  { %v1408_v13 = vpop.permute.xlu0 %1407 }
0x1528   :  { %v1410_v15 = vmul.f32 %v1408_v13, %v1405_v12 }
0x152a   :  { %v1412_v19 = vadd.f32 %v1411_v14, %v1410_v15 }
0x152b   :  { %v1415_v20 = vpop.permute.xlu0 %1414 }
0x152c   :  { %2065 = vtanh.f32 %v1412_v19  ;;  %v1417_v21 = vmul.f32 %v1415_v20, %v2347_v1 }
0x152e   :  { %1973 = vmatmul.mubr.msk.f32.vlgmr.msra.gmra.mxu0 %vm1500_vm4, %v1417_v21 }
0x152f   :  { %1990 = vmatprep.mubr.msk.f32.mxu0 %vm2232_vm0, %v2231_v0  ;;  %1987 = vmatpush3.msra.mxu0 %v1669_v28 }
0x1530   :  { %1988 = vmatprep.subr.mxu0 %v2231_v0 }
0x1531   :  { %1989 = vmatpush3.msra.mxu0 %v1668_v30 }
0x1539   :  { %v2066_v22 = vpop.eup %2065 }
0x153a   :  { %v1578_v23 = vmul.f32 %v2066_v22, %v1420_v3 }
0x153c   :  { %1584 = vrot.lane.b32.xlu1 %v1578_v23, %s2235_s3 }
0x156b   :  { %v1496_v24 = vpop.f32.mrf.mxu1 }
0x156d   :  { %v1969_v25 = vpop.f32.mrf.mxu1 }
0x15ae   :  { %v1585_v26 = vpop.permute.xlu1 %1584 }
0x15af   :  { %1984 = vmatmul.mubr.msk.f32.vlgmr.msra.gmra.mxu1 %vm229_vm2, %v1585_v26 }
0x15ee   :  { %v1574_v27 = vpop.f32.mrf.mxu0 }
0x15ef   :  { %v1575_v31 = vadd.f32 %v1574_v27, %v1496_v24 }
0x15f0   :  { %v1974_v1 = vpop.f32.mrf.mxu0 }
0x166f   :  { %v1654_v32 = vpop.f32.mrf.mxu1 }
0x1670   :  { %v1658_v34 = vadd.f32 %v1654_v32, %v1575_v31 }
0x1671   :  { %v1985_v36 = vpop.f32.mrf.mxu1 }
0x1672   :  { %v1666_v37 = vadd.f32 %v1800_v33, %v1658_v34 }
0x1674   :  { %2067 = vtanh.f32 %v1666_v37 }
0x1681   :  { %v2068_v38 = vpop.eup %2067 }
0x1682   :  { %1991 = vmatmul.mubr.msk.f32.vlgmr.msra.gmra.mxu0 %vm1677_vm5, %v2068_v38 }
0x1742   :  { %v1747_v40 = vpop.f32.mrf.mxu0 }
0x1743   :  { %v1748_v0 = vadd.f32 %v1801_v39, %v1747_v40 }
0x1744   :  { %v1992_v41 = vpop.f32.mrf.mxu0 }
0x1745   :  { %2069 = vtanh.f32 %v1748_v0 }
0x1752   :  { %v2070_v42 = vpop.eup %2069 }
0x1753   :  { %1752 = vst [vmem:[#allocation13] sm:$0xff] %v2070_v42 }
0x1754   :  { %2202 = shalt.err (!%p2199_p6)
}
0x1755   :  { %1762 = dma.vmem_to_hbm [thread:$0]  %s1760_s13, 128, %s2644_s15, [#allocation4]  }
0x1756   :  { %2219 = dma.done.wait [#allocation4], 128  }
0x1757   :  { %2220 = vsyncadd [#allocation4], 4294967168 }
0x1758   :  { %1766 = vsyncpa [#allocation3], 1 }
0x1759   :  { %1767 = vsyncpa [#allocation6], 1 }
0x175a   :  { %1768 = vsyncpa [#allocation9], 1 }
0x175b   :  { %1769 = vsyncpa [#allocation12], 1 }
0x175c   :  { %1770 = vsyncpa [#allocation4], 1 }

</bundles_post_ra>
